<compile_context>
chip_gen: v7x
topology: tpu7x:2x2x1
jax: 0.10.0
libtpu: 0.0.40
codegen_flags: <defaults>
</compile_context>

<pallas_src>
from functools import partial

import numpy as np

import jax
import jax.numpy as jnp
from jax.experimental import pallas as pl
from jax.experimental.pallas import tpu as pltpu

NUM_FILTERS = 4
RECURRENT_STEPS = 3
MIXER_K = 25
BN_EPS = 1e-5
SUBLANE = 8  # f32 sublane tile


def _sigmoid(z):
    # Numerically stable sigmoid via tanh (runs on the EUP slot).
    return 0.5 * (jnp.tanh(0.5 * z) + 1.0)


# ----------------------------------------------------------------------------
# Fused kernel: all recurrent steps (mixer + gates + per-step BatchNorm) for the
# whole batch, packed along the lane dimension.
# ----------------------------------------------------------------------------
def gru_bn_kernel(x_ref, h0_ref, masks_ref, mwf_ref, mb_ref,
                  wx_ref, bx_ref, whzr_ref, wnh_ref, gamma_ref, beta_ref,
                  out_ref, *, num_steps, pad, batch, length):
    CP, TOT = x_ref.shape                   # padded channels, packed lanes
    K = mwf_ref.shape[1] // CP

    x = x_ref[...]                          # (CP, TOT), zeros outside valid lanes
    mwf = mwf_ref[...]                      # (CP, K*CP)   mixer im2col weight
    mb = mb_ref[...]                        # (CP, 1)
    whzr = whzr_ref[...]                    # (2*CP, CP)   [Wzh; Wrh]
    wnh = wnh_ref[...]                      # (CP, CP)

    # x-side pre-activations of all three gates (+ folded biases): x's values
    # never change across steps, so compute once.
    gx = jnp.dot(wx_ref[...], x, preferred_element_type=jnp.float32) + bx_ref[...]
    gxz = gx[0:CP]
    gxr = gx[CP:2 * CP]
    gxn = gx[2 * CP:3 * CP]

    zcol = jnp.zeros((CP, pad), jnp.float32)
    zlane = jnp.zeros((CP, 1), jnp.float32)

    # TrainableHState: (CP, 1) parameter broadcast over the valid lanes.
    h = h0_ref[...] * masks_ref[0]          # (CP, TOT), masked

    for i in range(num_steps):
        # ---- mixer Conv1d(K, padding=K//2) + ReLU: one im2col contraction ----
        hext = jnp.concatenate([zcol, h, zcol], axis=1)          # (CP, TOT+2*pad)
        im2col = jnp.concatenate([hext[:, k:k + TOT] for k in range(K)], axis=0)
        h = jnp.maximum(
            jnp.dot(mwf, im2col, preferred_element_type=jnp.float32) + mb, 0.0)

        # ---- gates: z/r h-sides share one dot, x-sides precomputed -----------
        ghzr = jnp.dot(whzr, h, preferred_element_type=jnp.float32)  # (2CP, TOT)
        zt = _sigmoid(gxz + ghzr[0:CP])
        rt = _sigmoid(gxr + ghzr[CP:2 * CP])
        nt = jnp.tanh(gxn + jnp.dot(wnh, h * rt,
                                    preferred_element_type=jnp.float32))
        h = h + zt * (nt - h)               # == (1 - zt) * h + zt * nt

        # ---- shrink: x drops first / h drops last  ==  shift h right by one
        #      lane and keep only the next step's valid lanes ------------------
        m = masks_ref[i + 1]                # (1, TOT)
        h = jnp.concatenate([zlane, h[:, :TOT - 1]], axis=1) * m

        # ---- per-step BatchNorm1d (training mode: biased batch stats) --------
        inv_n = 1.0 / float(batch * (length - i - 1))
        mean = jnp.sum(h, axis=1, keepdims=True) * inv_n          # (CP, 1)
        hc = (h - mean) * m
        var = jnp.sum(hc * hc, axis=1, keepdims=True) * inv_n
        inv_std = jax.lax.rsqrt(var + BN_EPS)
        h = (hc * (inv_std * gamma_ref[i]) + beta_ref[i]) * m

    out_ref[...] = h


def _full_spec(a):
    nd = a.ndim
    return pl.BlockSpec(a.shape, lambda i: (0,) * nd)


# ----------------------------------------------------------------------------
# Wrapper: lane packing, channel padding, weight folding, one pallas_call.
# ----------------------------------------------------------------------------
def parallel_gru_v9(x, hinit, mixer_w, mixer_b,
                    wzx, bzx, wzh, bzh, wrx, brx, wrh, brh,
                    wnx, bnx, wnh, bnh, bn_gamma, bn_beta,
                    num_steps=RECURRENT_STEPS):
    B, C, L = x.shape
    K = mixer_w.shape[-1]
    pad = K // 2
    CP = ((C + SUBLANE - 1) // SUBLANE) * SUBLANE       # pad channels to a tile
    W = L + 2 * pad                                     # per-batch lane segment
    TOT = B * W                                         # packed lane width

    f32 = jnp.float32

    # ---- lane-packed input: (CP, B*W); segment zeros double as conv padding --
    xp = jnp.pad(x.astype(f32), ((0, 0), (0, CP - C), (pad, pad)))
    x_packed = jnp.transpose(xp, (1, 0, 2)).reshape(CP, TOT)

    # ---- per-step lane-validity masks (fixed buffers instead of shrinking) ---
    pos = np.arange(TOT) % W
    masks = np.stack([((pos >= pad + i) & (pos < pad + L)).astype(np.float32)
                      for i in range(num_steps + 1)])[:, None, :]
    masks = jnp.asarray(masks)                          # (S+1, 1, TOT)

    # ---- parameters, zero-padded to CP channels -------------------------------
    def pad_mat(w):                                     # (C, C) -> (CP, CP)
        return jnp.pad(w.astype(f32), ((0, CP - C), (0, CP - C)))

    def pad_col(b):                                     # (C,) -> (CP, 1)
        return jnp.pad(b.astype(f32), (0, CP - C)).reshape(CP, 1)

    # mixer as one (CP, K*CP) im2col weight: mw_pad[o, k*CP + i] = w[o, i, k]
    mwt = jnp.transpose(mixer_w.astype(f32), (0, 2, 1))             # (C, K, C)
    mw_pad = jnp.pad(mwt, ((0, CP - C), (0, 0), (0, CP - C))).reshape(CP, K * CP)
    mb_pad = pad_col(mixer_b)

    # x-side weights of all three gates stacked; both gate biases folded in.
    wx_all = jnp.concatenate([pad_mat(wzx[:, :, 0]), pad_mat(wrx[:, :, 0]),
                              pad_mat(wnx[:, :, 0])], axis=0)        # (3CP, CP)
    bx_all = jnp.concatenate([pad_col(bzx + bzh), pad_col(brx + brh),
                              pad_col(bnx + bnh)], axis=0)           # (3CP, 1)
    # h-side weights: z/r stacked, n separate.
    whzr = jnp.concatenate([pad_mat(wzh[:, :, 0]), pad_mat(wrh[:, :, 0])], axis=0)
    wnh_p = pad_mat(wnh[:, :, 0])

    h0_p = pad_col(hinit.reshape(C))
    gamma_p = jnp.pad(bn_gamma.astype(f32), ((0, 0), (0, CP - C)))[:, :, None]
    beta_p = jnp.pad(bn_beta.astype(f32), ((0, 0), (0, CP - C)))[:, :, None]

    kernel = partial(gru_bn_kernel, num_steps=num_steps, pad=pad,
                     batch=B, length=L)

    args = (x_packed, h0_p, masks, mw_pad, mb_pad, wx_all, bx_all,
            whzr, wnh_p, gamma_p, beta_p)

    out_packed = pl.pallas_call(
        kernel,
        out_shape=jax.ShapeDtypeStruct((CP, TOT), f32),
        grid=(1,),
        in_specs=[_full_spec(a) for a in args],
        out_specs=pl.BlockSpec((CP, TOT), lambda i: (0, 0)),
        compiler_params=pltpu.CompilerParams(dimension_semantics=("arbitrary",)),
    )(*args)

    # unpack lanes -> (B, C, L - num_steps); valid region is [pad+S, pad+L)
    out = out_packed.reshape(CP, B, W).transpose(1, 0, 2)
    return out[:, :C, pad + num_steps:pad + L].astype(x.dtype)


# ----------------------------------------------------------------------------
# Pure-JAX reference of ParallelGRULayerv9 (correctness check only).
# ----------------------------------------------------------------------------
def _conv1x1(t, w, b):
    return jnp.einsum('oc,bcl->bol', w[:, :, 0], t) + b.reshape(1, -1, 1)


def reference_forward(x, hinit, mixer_w, mixer_b,
                      wzx, bzx, wzh, bzh, wrx, brx, wrh, brh,
                      wnx, bnx, wnh, bnh, bn_gamma, bn_beta,
                      num_steps=RECURRENT_STEPS):
    B, C, L = x.shape
    pad = mixer_w.shape[-1] // 2
    h = jnp.broadcast_to(hinit.reshape(1, C, 1), (B, C, L))
    for i in range(num_steps):
        h = jax.lax.conv_general_dilated(
            h, mixer_w, window_strides=(1,), padding=[(pad, pad)],
            dimension_numbers=('NCH', 'OIH', 'NCH')) + mixer_b.reshape(1, C, 1)
        h = jnp.maximum(h, 0.0)
        zt = jax.nn.sigmoid(_conv1x1(x, wzx, bzx) + _conv1x1(h, wzh, bzh))
        rt = jax.nn.sigmoid(_conv1x1(x, wrx, brx) + _conv1x1(h, wrh, brh))
        nt = jnp.tanh(_conv1x1(x, wnx, bnx) + _conv1x1(h * rt, wnh, bnh))
        h = (1.0 - zt) * h + zt * nt
        x = x[:, :, 1:]
        h = h[:, :, :-1]
        mean = jnp.mean(h, axis=(0, 2), keepdims=True)
        var = jnp.mean((h - mean) ** 2, axis=(0, 2), keepdims=True)
        h = (h - mean) / jnp.sqrt(var + BN_EPS) * bn_gamma[i].reshape(1, C, 1) \
            + bn_beta[i].reshape(1, C, 1)
    return h


if __name__ == "__main__":
    B, C, L, K, S = 2, NUM_FILTERS, 16, MIXER_K, RECURRENT_STEPS

    key = jax.random.PRNGKey(0)
    keys = jax.random.split(key, 16)

    def uni(k, shape, fan_in):
        bound = 1.0 / float(np.sqrt(fan_in))
        return jax.random.uniform(k, shape, jnp.float32, -bound, bound)

    # Deterministic parameter init (shapes match the PyTorch module's __init__).
    x = jax.random.normal(keys[0], (B, C, L), jnp.float32)
    hinit = jax.random.normal(keys[1], (1, C, 1), jnp.float32)     # TrainableHState
    mixer_w = uni(keys[2], (C, C, K), C * K)                       # Conv1d(C, C, 25)
    mixer_b = uni(keys[3], (C,), C * K)
    wzx = uni(keys[4], (C, C, 1), C); bzx = uni(keys[5], (C,), C)  # s2szx
    wzh = uni(keys[6], (C, C, 1), C); bzh = uni(keys[7], (C,), C)  # s2szh
    wrx = uni(keys[8], (C, C, 1), C); brx = uni(keys[9], (C,), C)  # s2srx
    wrh = uni(keys[10], (C, C, 1), C); brh = uni(keys[11], (C,), C)  # s2srh
    wnx = uni(keys[12], (C, C, 1), C); bnx = uni(keys[13], (C,), C)  # s2snx
    wnh = uni(keys[14], (C, C, 1), C); bnh = uni(keys[15], (C,), C)  # s2snh
    bn_gamma = jnp.ones((S, C), jnp.float32)                       # fresh BatchNorm1d
    bn_beta = jnp.zeros((S, C), jnp.float32)

    out = parallel_gru_v9(x, hinit, mixer_w, mixer_b,
                          wzx, bzx, wzh, bzh, wrx, brx, wrh, brh,
                          wnx, bnx, wnh, bnh, bn_gamma, bn_beta)
    out = jax.block_until_ready(out)
    assert out.shape == (B, C, L - S)

    ref = reference_forward(x, hinit, mixer_w, mixer_b,
                            wzx, bzx, wzh, bzh, wrx, brx, wrh, brh,
                            wnx, bnx, wnh, bnh, bn_gamma, bn_beta)
    np.testing.assert_allclose(np.asarray(out), np.asarray(ref),
                               atol=5e-2, rtol=5e-2)

    print("KERNEL_OK")
</pallas_src>

<mosaic_0001>
module attributes {stable_mosaic.version = 11 : i64} {
  func.func @gru_bn_kernel(%arg0: i32, %arg1: memref<8x80xf32, #tpu.memory_space<vmem>>, %arg2: memref<8x1xf32, #tpu.memory_space<vmem>>, %arg3: memref<4x1x80xf32, #tpu.memory_space<vmem>>, %arg4: memref<8x200xf32, #tpu.memory_space<vmem>>, %arg5: memref<8x1xf32, #tpu.memory_space<vmem>>, %arg6: memref<24x8xf32, #tpu.memory_space<vmem>>, %arg7: memref<24x1xf32, #tpu.memory_space<vmem>>, %arg8: memref<16x8xf32, #tpu.memory_space<vmem>>, %arg9: memref<8x8xf32, #tpu.memory_space<vmem>>, %arg10: memref<3x8x1xf32, #tpu.memory_space<vmem>>, %arg11: memref<3x8x1xf32, #tpu.memory_space<vmem>>, %arg12: memref<8x80xf32, #tpu.memory_space<vmem>>) attributes {dimension_semantics = [#tpu.dimension_semantics<arbitrary>], iteration_bounds = array<i64: 1>, scalar_prefetch = 0 : i64, scratch_operands = 0 : i64, tpu.core_type = #tpu.core_type<tc>, window_params = [{pipeline_mode = #tpu.pipeline_mode<synchronous>, transform_indices = @transform_0, window_bounds = array<i64: 8, 80>}, {pipeline_mode = #tpu.pipeline_mode<synchronous>, transform_indices = @transform_1, window_bounds = array<i64: 8, 1>}, {pipeline_mode = #tpu.pipeline_mode<synchronous>, transform_indices = @transform_2, window_bounds = array<i64: 4, 1, 80>}, {pipeline_mode = #tpu.pipeline_mode<synchronous>, transform_indices = @transform_3, window_bounds = array<i64: 8, 200>}, {pipeline_mode = #tpu.pipeline_mode<synchronous>, transform_indices = @transform_4, window_bounds = array<i64: 8, 1>}, {pipeline_mode = #tpu.pipeline_mode<synchronous>, transform_indices = @transform_5, window_bounds = array<i64: 24, 8>}, {pipeline_mode = #tpu.pipeline_mode<synchronous>, transform_indices = @transform_6, window_bounds = array<i64: 24, 1>}, {pipeline_mode = #tpu.pipeline_mode<synchronous>, transform_indices = @transform_7, window_bounds = array<i64: 16, 8>}, {pipeline_mode = #tpu.pipeline_mode<synchronous>, transform_indices = @transform_8, window_bounds = array<i64: 8, 8>}, {pipeline_mode = #tpu.pipeline_mode<synchronous>, transform_indices = @transform_9, window_bounds = array<i64: 3, 8, 1>}, {pipeline_mode = #tpu.pipeline_mode<synchronous>, transform_indices = @transform_10, window_bounds = array<i64: 3, 8, 1>}, {pipeline_mode = #tpu.pipeline_mode<synchronous>, transform_indices = @transform_11, window_bounds = array<i64: 8, 80>}]} {
    %c0 = arith.constant 0 : index
    %c0_0 = arith.constant 0 : index
    %0 = vector.load %arg1[%c0, %c0_0] : memref<8x80xf32, #tpu.memory_space<vmem>>, vector<8x80xf32>
    %c0_1 = arith.constant 0 : index
    %c0_2 = arith.constant 0 : index
    %1 = vector.load %arg4[%c0_1, %c0_2] : memref<8x200xf32, #tpu.memory_space<vmem>>, vector<8x200xf32>
    %c0_3 = arith.constant 0 : index
    %c0_4 = arith.constant 0 : index
    %2 = vector.load %arg5[%c0_3, %c0_4] : memref<8x1xf32, #tpu.memory_space<vmem>>, vector<8x1xf32>
    %c0_5 = arith.constant 0 : index
    %c0_6 = arith.constant 0 : index
    %3 = vector.load %arg8[%c0_5, %c0_6] : memref<16x8xf32, #tpu.memory_space<vmem>>, vector<16x8xf32>
    %c0_7 = arith.constant 0 : index
    %c0_8 = arith.constant 0 : index
    %4 = vector.load %arg9[%c0_7, %c0_8] : memref<8x8xf32, #tpu.memory_space<vmem>>, vector<8x8xf32>
    %c0_9 = arith.constant 0 : index
    %c0_10 = arith.constant 0 : index
    %5 = vector.load %arg6[%c0_9, %c0_10] : memref<24x8xf32, #tpu.memory_space<vmem>>, vector<24x8xf32>
    %cst = arith.constant dense<0.000000e+00> : vector<24x80xf32>
    %6 = tpu.matmul %5, %0, %cst {dimension_numbers = #tpu.dot_dimension_numbers<[1], [0], [0], [1], [0, 0, 1, 1], [], []>} : vector<24x8xf32>, vector<8x80xf32>, vector<24x80xf32> -> vector<24x80xf32>
    %c0_11 = arith.constant 0 : index
    %c0_12 = arith.constant 0 : index
    %7 = vector.load %arg7[%c0_11, %c0_12] : memref<24x1xf32, #tpu.memory_space<vmem>>, vector<24x1xf32>
    %8 = vector.broadcast %7 : vector<24x1xf32> to vector<24x80xf32>
    %9 = arith.addf %6, %8 : vector<24x80xf32>
    %10 = vector.extract_strided_slice %9 {offsets = [0, 0], sizes = [8, 80], strides = [1, 1]} : vector<24x80xf32> to vector<8x80xf32>
    %11 = vector.extract_strided_slice %9 {offsets = [8, 0], sizes = [8, 80], strides = [1, 1]} : vector<24x80xf32> to vector<8x80xf32>
    %12 = vector.extract_strided_slice %9 {offsets = [16, 0], sizes = [8, 80], strides = [1, 1]} : vector<24x80xf32> to vector<8x80xf32>
    %cst_13 = arith.constant 0.000000e+00 : f32
    %13 = vector.broadcast %cst_13 : f32 to vector<8x12xf32>
    %cst_14 = arith.constant 0.000000e+00 : f32
    %14 = vector.broadcast %cst_14 : f32 to vector<8x1xf32>
    %c0_15 = arith.constant 0 : index
    %c0_16 = arith.constant 0 : index
    %15 = vector.load %arg2[%c0_15, %c0_16] : memref<8x1xf32, #tpu.memory_space<vmem>>, vector<8x1xf32>
    %c0_17 = arith.constant 0 : index
    %c0_18 = arith.constant 0 : index
    %c0_19 = arith.constant 0 : index
    %16 = vector.load %arg3[%c0_17, %c0_18, %c0_19] : memref<4x1x80xf32, #tpu.memory_space<vmem>>, vector<1x1x80xf32>
    %17 = vector.shape_cast %16 : vector<1x1x80xf32> to vector<1x80xf32>
    %18 = vector.broadcast %15 : vector<8x1xf32> to vector<8x80xf32>
    %19 = vector.broadcast %17 : vector<1x80xf32> to vector<8x80xf32>
    %20 = arith.mulf %18, %19 : vector<8x80xf32>
    %21 = tpu.concatenate %13, %20, %13 in 1 : vector<8x12xf32>, vector<8x80xf32>, vector<8x12xf32> -> vector<8x104xf32>
    %22 = vector.extract_strided_slice %21 {offsets = [0, 0], sizes = [8, 80], strides = [1, 1]} : vector<8x104xf32> to vector<8x80xf32>
    %23 = vector.extract_strided_slice %21 {offsets = [0, 1], sizes = [8, 80], strides = [1, 1]} : vector<8x104xf32> to vector<8x80xf32>
    %24 = vector.extract_strided_slice %21 {offsets = [0, 2], sizes = [8, 80], strides = [1, 1]} : vector<8x104xf32> to vector<8x80xf32>
    %25 = vector.extract_strided_slice %21 {offsets = [0, 3], sizes = [8, 80], strides = [1, 1]} : vector<8x104xf32> to vector<8x80xf32>
    %26 = vector.extract_strided_slice %21 {offsets = [0, 4], sizes = [8, 80], strides = [1, 1]} : vector<8x104xf32> to vector<8x80xf32>
    %27 = vector.extract_strided_slice %21 {offsets = [0, 5], sizes = [8, 80], strides = [1, 1]} : vector<8x104xf32> to vector<8x80xf32>
    %28 = vector.extract_strided_slice %21 {offsets = [0, 6], sizes = [8, 80], strides = [1, 1]} : vector<8x104xf32> to vector<8x80xf32>
    %29 = vector.extract_strided_slice %21 {offsets = [0, 7], sizes = [8, 80], strides = [1, 1]} : vector<8x104xf32> to vector<8x80xf32>
    %30 = vector.extract_strided_slice %21 {offsets = [0, 8], sizes = [8, 80], strides = [1, 1]} : vector<8x104xf32> to vector<8x80xf32>
    %31 = vector.extract_strided_slice %21 {offsets = [0, 9], sizes = [8, 80], strides = [1, 1]} : vector<8x104xf32> to vector<8x80xf32>
    %32 = vector.extract_strided_slice %21 {offsets = [0, 10], sizes = [8, 80], strides = [1, 1]} : vector<8x104xf32> to vector<8x80xf32>
    %33 = vector.extract_strided_slice %21 {offsets = [0, 11], sizes = [8, 80], strides = [1, 1]} : vector<8x104xf32> to vector<8x80xf32>
    %34 = vector.extract_strided_slice %21 {offsets = [0, 12], sizes = [8, 80], strides = [1, 1]} : vector<8x104xf32> to vector<8x80xf32>
    %35 = vector.extract_strided_slice %21 {offsets = [0, 13], sizes = [8, 80], strides = [1, 1]} : vector<8x104xf32> to vector<8x80xf32>
    %36 = vector.extract_strided_slice %21 {offsets = [0, 14], sizes = [8, 80], strides = [1, 1]} : vector<8x104xf32> to vector<8x80xf32>
    %37 = vector.extract_strided_slice %21 {offsets = [0, 15], sizes = [8, 80], strides = [1, 1]} : vector<8x104xf32> to vector<8x80xf32>
    %38 = vector.extract_strided_slice %21 {offsets = [0, 16], sizes = [8, 80], strides = [1, 1]} : vector<8x104xf32> to vector<8x80xf32>
    %39 = vector.extract_strided_slice %21 {offsets = [0, 17], sizes = [8, 80], strides = [1, 1]} : vector<8x104xf32> to vector<8x80xf32>
    %40 = vector.extract_strided_slice %21 {offsets = [0, 18], sizes = [8, 80], strides = [1, 1]} : vector<8x104xf32> to vector<8x80xf32>
    %41 = vector.extract_strided_slice %21 {offsets = [0, 19], sizes = [8, 80], strides = [1, 1]} : vector<8x104xf32> to vector<8x80xf32>
    %42 = vector.extract_strided_slice %21 {offsets = [0, 20], sizes = [8, 80], strides = [1, 1]} : vector<8x104xf32> to vector<8x80xf32>
    %43 = vector.extract_strided_slice %21 {offsets = [0, 21], sizes = [8, 80], strides = [1, 1]} : vector<8x104xf32> to vector<8x80xf32>
    %44 = vector.extract_strided_slice %21 {offsets = [0, 22], sizes = [8, 80], strides = [1, 1]} : vector<8x104xf32> to vector<8x80xf32>
    %45 = vector.extract_strided_slice %21 {offsets = [0, 23], sizes = [8, 80], strides = [1, 1]} : vector<8x104xf32> to vector<8x80xf32>
    %46 = vector.extract_strided_slice %21 {offsets = [0, 24], sizes = [8, 80], strides = [1, 1]} : vector<8x104xf32> to vector<8x80xf32>
    %47 = tpu.concatenate %22, %23, %24, %25, %26, %27, %28, %29, %30, %31, %32, %33, %34, %35, %36, %37 in 0 : vector<8x80xf32>, vector<8x80xf32>, vector<8x80xf32>, vector<8x80xf32>, vector<8x80xf32>, vector<8x80xf32>, vector<8x80xf32>, vector<8x80xf32>, vector<8x80xf32>, vector<8x80xf32>, vector<8x80xf32>, vector<8x80xf32>, vector<8x80xf32>, vector<8x80xf32>, vector<8x80xf32>, vector<8x80xf32> -> vector<128x80xf32>
    %48 = tpu.concatenate %38, %39, %40, %41, %42, %43, %44, %45, %46 in 0 : vector<8x80xf32>, vector<8x80xf32>, vector<8x80xf32>, vector<8x80xf32>, vector<8x80xf32>, vector<8x80xf32>, vector<8x80xf32>, vector<8x80xf32>, vector<8x80xf32> -> vector<72x80xf32>
    %49 = tpu.concatenate %47, %48 in 0 : vector<128x80xf32>, vector<72x80xf32> -> vector<200x80xf32>
    %cst_20 = arith.constant dense<0.000000e+00> : vector<8x80xf32>
    %50 = tpu.matmul %1, %49, %cst_20 {dimension_numbers = #tpu.dot_dimension_numbers<[1], [0], [0], [1], [0, 0, 1, 1], [], []>} : vector<8x200xf32>, vector<200x80xf32>, vector<8x80xf32> -> vector<8x80xf32>
    %51 = vector.broadcast %2 : vector<8x1xf32> to vector<8x80xf32>
    %52 = arith.addf %50, %51 : vector<8x80xf32>
    %cst_21 = arith.constant 0.000000e+00 : f32
    %53 = vector.broadcast %cst_21 : f32 to vector<8x80xf32>
    %54 = arith.maximumf %52, %53 : vector<8x80xf32>
    %cst_22 = arith.constant dense<0.000000e+00> : vector<16x80xf32>
    %55 = tpu.matmul %3, %54, %cst_22 {dimension_numbers = #tpu.dot_dimension_numbers<[1], [0], [0], [1], [0, 0, 1, 1], [], []>} : vector<16x8xf32>, vector<8x80xf32>, vector<16x80xf32> -> vector<16x80xf32>
    %56 = vector.extract_strided_slice %55 {offsets = [0, 0], sizes = [8, 80], strides = [1, 1]} : vector<16x80xf32> to vector<8x80xf32>
    %57 = arith.addf %10, %56 : vector<8x80xf32>
    %cst_23 = arith.constant 5.000000e-01 : f32
    %58 = vector.broadcast %cst_23 : f32 to vector<8x80xf32>
    %59 = arith.mulf %58, %57 : vector<8x80xf32>
    %60 = math.tanh %59 : vector<8x80xf32>
    %cst_24 = arith.constant 1.000000e+00 : f32
    %61 = vector.broadcast %cst_24 : f32 to vector<8x80xf32>
    %62 = arith.addf %60, %61 : vector<8x80xf32>
    %cst_25 = arith.constant 5.000000e-01 : f32
    %63 = vector.broadcast %cst_25 : f32 to vector<8x80xf32>
    %64 = arith.mulf %63, %62 : vector<8x80xf32>
    %65 = vector.extract_strided_slice %55 {offsets = [8, 0], sizes = [8, 80], strides = [1, 1]} : vector<16x80xf32> to vector<8x80xf32>
    %66 = arith.addf %11, %65 : vector<8x80xf32>
    %cst_26 = arith.constant 5.000000e-01 : f32
    %67 = vector.broadcast %cst_26 : f32 to vector<8x80xf32>
    %68 = arith.mulf %67, %66 : vector<8x80xf32>
    %69 = math.tanh %68 : vector<8x80xf32>
    %cst_27 = arith.constant 1.000000e+00 : f32
    %70 = vector.broadcast %cst_27 : f32 to vector<8x80xf32>
    %71 = arith.addf %69, %70 : vector<8x80xf32>
    %cst_28 = arith.constant 5.000000e-01 : f32
    %72 = vector.broadcast %cst_28 : f32 to vector<8x80xf32>
    %73 = arith.mulf %72, %71 : vector<8x80xf32>
    %74 = arith.mulf %54, %73 : vector<8x80xf32>
    %cst_29 = arith.constant dense<0.000000e+00> : vector<8x80xf32>
    %75 = tpu.matmul %4, %74, %cst_29 {dimension_numbers = #tpu.dot_dimension_numbers<[1], [0], [0], [1], [0, 0, 1, 1], [], []>} : vector<8x8xf32>, vector<8x80xf32>, vector<8x80xf32> -> vector<8x80xf32>
    %76 = arith.addf %12, %75 : vector<8x80xf32>
    %77 = math.tanh %76 : vector<8x80xf32>
    %78 = arith.subf %77, %54 : vector<8x80xf32>
    %79 = arith.mulf %64, %78 : vector<8x80xf32>
    %80 = arith.addf %54, %79 : vector<8x80xf32>
    %c1 = arith.constant 1 : index
    %c0_30 = arith.constant 0 : index
    %c0_31 = arith.constant 0 : index
    %81 = vector.load %arg3[%c1, %c0_30, %c0_31] : memref<4x1x80xf32, #tpu.memory_space<vmem>>, vector<1x1x80xf32>
    %82 = vector.shape_cast %81 : vector<1x1x80xf32> to vector<1x80xf32>
    %83 = vector.extract_strided_slice %80 {offsets = [0, 0], sizes = [8, 79], strides = [1, 1]} : vector<8x80xf32> to vector<8x79xf32>
    %84 = tpu.concatenate %14, %83 in 1 : vector<8x1xf32>, vector<8x79xf32> -> vector<8x80xf32>
    %85 = vector.broadcast %82 : vector<1x80xf32> to vector<8x80xf32>
    %86 = arith.mulf %84, %85 : vector<8x80xf32>
    %cst_32 = arith.constant dense<0.000000e+00> : vector<8xf32>
    %87 = vector.multi_reduction <add>, %86, %cst_32 [1] : vector<8x80xf32> to vector<8xf32>
    %88 = vector.shape_cast %87 : vector<8xf32> to vector<8x1xf32>
    %cst_33 = arith.constant 0.0333333351 : f32
    %89 = vector.broadcast %cst_33 : f32 to vector<8x1xf32>
    %90 = arith.mulf %88, %89 : vector<8x1xf32>
    %91 = vector.broadcast %90 : vector<8x1xf32> to vector<8x80xf32>
    %92 = arith.subf %86, %91 : vector<8x80xf32>
    %93 = vector.broadcast %82 : vector<1x80xf32> to vector<8x80xf32>
    %94 = arith.mulf %92, %93 : vector<8x80xf32>
    %95 = arith.mulf %94, %94 : vector<8x80xf32>
    %cst_34 = arith.constant dense<0.000000e+00> : vector<8xf32>
    %96 = vector.multi_reduction <add>, %95, %cst_34 [1] : vector<8x80xf32> to vector<8xf32>
    %97 = vector.shape_cast %96 : vector<8xf32> to vector<8x1xf32>
    %cst_35 = arith.constant 0.0333333351 : f32
    %98 = vector.broadcast %cst_35 : f32 to vector<8x1xf32>
    %99 = arith.mulf %97, %98 : vector<8x1xf32>
    %cst_36 = arith.constant 9.99999974E-6 : f32
    %100 = vector.broadcast %cst_36 : f32 to vector<8x1xf32>
    %101 = arith.addf %99, %100 : vector<8x1xf32>
    %102 = math.rsqrt %101 : vector<8x1xf32>
    %c0_37 = arith.constant 0 : index
    %c0_38 = arith.constant 0 : index
    %c0_39 = arith.constant 0 : index
    %103 = vector.load %arg10[%c0_37, %c0_38, %c0_39] : memref<3x8x1xf32, #tpu.memory_space<vmem>>, vector<1x8x1xf32>
    %104 = vector.shape_cast %103 : vector<1x8x1xf32> to vector<8x1xf32>
    %105 = arith.mulf %102, %104 : vector<8x1xf32>
    %106 = vector.broadcast %105 : vector<8x1xf32> to vector<8x80xf32>
    %107 = arith.mulf %94, %106 : vector<8x80xf32>
    %c0_40 = arith.constant 0 : index
    %c0_41 = arith.constant 0 : index
    %c0_42 = arith.constant 0 : index
    %108 = vector.load %arg11[%c0_40, %c0_41, %c0_42] : memref<3x8x1xf32, #tpu.memory_space<vmem>>, vector<1x8x1xf32>
    %109 = vector.shape_cast %108 : vector<1x8x1xf32> to vector<8x1xf32>
    %110 = vector.broadcast %109 : vector<8x1xf32> to vector<8x80xf32>
    %111 = arith.addf %107, %110 : vector<8x80xf32>
    %112 = vector.broadcast %82 : vector<1x80xf32> to vector<8x80xf32>
    %113 = arith.mulf %111, %112 : vector<8x80xf32>
    %114 = tpu.concatenate %13, %113, %13 in 1 : vector<8x12xf32>, vector<8x80xf32>, vector<8x12xf32> -> vector<8x104xf32>
    %115 = vector.extract_strided_slice %114 {offsets = [0, 0], sizes = [8, 80], strides = [1, 1]} : vector<8x104xf32> to vector<8x80xf32>
    %116 = vector.extract_strided_slice %114 {offsets = [0, 1], sizes = [8, 80], strides = [1, 1]} : vector<8x104xf32> to vector<8x80xf32>
    %117 = vector.extract_strided_slice %114 {offsets = [0, 2], sizes = [8, 80], strides = [1, 1]} : vector<8x104xf32> to vector<8x80xf32>
    %118 = vector.extract_strided_slice %114 {offsets = [0, 3], sizes = [8, 80], strides = [1, 1]} : vector<8x104xf32> to vector<8x80xf32>
    %119 = vector.extract_strided_slice %114 {offsets = [0, 4], sizes = [8, 80], strides = [1, 1]} : vector<8x104xf32> to vector<8x80xf32>
    %120 = vector.extract_strided_slice %114 {offsets = [0, 5], sizes = [8, 80], strides = [1, 1]} : vector<8x104xf32> to vector<8x80xf32>
    %121 = vector.extract_strided_slice %114 {offsets = [0, 6], sizes = [8, 80], strides = [1, 1]} : vector<8x104xf32> to vector<8x80xf32>
    %122 = vector.extract_strided_slice %114 {offsets = [0, 7], sizes = [8, 80], strides = [1, 1]} : vector<8x104xf32> to vector<8x80xf32>
    %123 = vector.extract_strided_slice %114 {offsets = [0, 8], sizes = [8, 80], strides = [1, 1]} : vector<8x104xf32> to vector<8x80xf32>
    %124 = vector.extract_strided_slice %114 {offsets = [0, 9], sizes = [8, 80], strides = [1, 1]} : vector<8x104xf32> to vector<8x80xf32>
    %125 = vector.extract_strided_slice %114 {offsets = [0, 10], sizes = [8, 80], strides = [1, 1]} : vector<8x104xf32> to vector<8x80xf32>
    %126 = vector.extract_strided_slice %114 {offsets = [0, 11], sizes = [8, 80], strides = [1, 1]} : vector<8x104xf32> to vector<8x80xf32>
    %127 = vector.extract_strided_slice %114 {offsets = [0, 12], sizes = [8, 80], strides = [1, 1]} : vector<8x104xf32> to vector<8x80xf32>
    %128 = vector.extract_strided_slice %114 {offsets = [0, 13], sizes = [8, 80], strides = [1, 1]} : vector<8x104xf32> to vector<8x80xf32>
    %129 = vector.extract_strided_slice %114 {offsets = [0, 14], sizes = [8, 80], strides = [1, 1]} : vector<8x104xf32> to vector<8x80xf32>
    %130 = vector.extract_strided_slice %114 {offsets = [0, 15], sizes = [8, 80], strides = [1, 1]} : vector<8x104xf32> to vector<8x80xf32>
    %131 = vector.extract_strided_slice %114 {offsets = [0, 16], sizes = [8, 80], strides = [1, 1]} : vector<8x104xf32> to vector<8x80xf32>
    %132 = vector.extract_strided_slice %114 {offsets = [0, 17], sizes = [8, 80], strides = [1, 1]} : vector<8x104xf32> to vector<8x80xf32>
    %133 = vector.extract_strided_slice %114 {offsets = [0, 18], sizes = [8, 80], strides = [1, 1]} : vector<8x104xf32> to vector<8x80xf32>
    %134 = vector.extract_strided_slice %114 {offsets = [0, 19], sizes = [8, 80], strides = [1, 1]} : vector<8x104xf32> to vector<8x80xf32>
    %135 = vector.extract_strided_slice %114 {offsets = [0, 20], sizes = [8, 80], strides = [1, 1]} : vector<8x104xf32> to vector<8x80xf32>
    %136 = vector.extract_strided_slice %114 {offsets = [0, 21], sizes = [8, 80], strides = [1, 1]} : vector<8x104xf32> to vector<8x80xf32>
    %137 = vector.extract_strided_slice %114 {offsets = [0, 22], sizes = [8, 80], strides = [1, 1]} : vector<8x104xf32> to vector<8x80xf32>
    %138 = vector.extract_strided_slice %114 {offsets = [0, 23], sizes = [8, 80], strides = [1, 1]} : vector<8x104xf32> to vector<8x80xf32>
    %139 = vector.extract_strided_slice %114 {offsets = [0, 24], sizes = [8, 80], strides = [1, 1]} : vector<8x104xf32> to vector<8x80xf32>
    %140 = tpu.concatenate %115, %116, %117, %118, %119, %120, %121, %122, %123, %124, %125, %126, %127, %128, %129, %130 in 0 : vector<8x80xf32>, vector<8x80xf32>, vector<8x80xf32>, vector<8x80xf32>, vector<8x80xf32>, vector<8x80xf32>, vector<8x80xf32>, vector<8x80xf32>, vector<8x80xf32>, vector<8x80xf32>, vector<8x80xf32>, vector<8x80xf32>, vector<8x80xf32>, vector<8x80xf32>, vector<8x80xf32>, vector<8x80xf32> -> vector<128x80xf32>
    %141 = tpu.concatenate %131, %132, %133, %134, %135, %136, %137, %138, %139 in 0 : vector<8x80xf32>, vector<8x80xf32>, vector<8x80xf32>, vector<8x80xf32>, vector<8x80xf32>, vector<8x80xf32>, vector<8x80xf32>, vector<8x80xf32>, vector<8x80xf32> -> vector<72x80xf32>
    %142 = tpu.concatenate %140, %141 in 0 : vector<128x80xf32>, vector<72x80xf32> -> vector<200x80xf32>
    %cst_43 = arith.constant dense<0.000000e+00> : vector<8x80xf32>
    %143 = tpu.matmul %1, %142, %cst_43 {dimension_numbers = #tpu.dot_dimension_numbers<[1], [0], [0], [1], [0, 0, 1, 1], [], []>} : vector<8x200xf32>, vector<200x80xf32>, vector<8x80xf32> -> vector<8x80xf32>
    %144 = vector.broadcast %2 : vector<8x1xf32> to vector<8x80xf32>
    %145 = arith.addf %143, %144 : vector<8x80xf32>
    %cst_44 = arith.constant 0.000000e+00 : f32
    %146 = vector.broadcast %cst_44 : f32 to vector<8x80xf32>
    %147 = arith.maximumf %145, %146 : vector<8x80xf32>
    %cst_45 = arith.constant dense<0.000000e+00> : vector<16x80xf32>
    %148 = tpu.matmul %3, %147, %cst_45 {dimension_numbers = #tpu.dot_dimension_numbers<[1], [0], [0], [1], [0, 0, 1, 1], [], []>} : vector<16x8xf32>, vector<8x80xf32>, vector<16x80xf32> -> vector<16x80xf32>
    %149 = vector.extract_strided_slice %148 {offsets = [0, 0], sizes = [8, 80], strides = [1, 1]} : vector<16x80xf32> to vector<8x80xf32>
    %150 = arith.addf %10, %149 : vector<8x80xf32>
    %cst_46 = arith.constant 5.000000e-01 : f32
    %151 = vector.broadcast %cst_46 : f32 to vector<8x80xf32>
    %152 = arith.mulf %151, %150 : vector<8x80xf32>
    %153 = math.tanh %152 : vector<8x80xf32>
    %cst_47 = arith.constant 1.000000e+00 : f32
    %154 = vector.broadcast %cst_47 : f32 to vector<8x80xf32>
    %155 = arith.addf %153, %154 : vector<8x80xf32>
    %cst_48 = arith.constant 5.000000e-01 : f32
    %156 = vector.broadcast %cst_48 : f32 to vector<8x80xf32>
    %157 = arith.mulf %156, %155 : vector<8x80xf32>
    %158 = vector.extract_strided_slice %148 {offsets = [8, 0], sizes = [8, 80], strides = [1, 1]} : vector<16x80xf32> to vector<8x80xf32>
    %159 = arith.addf %11, %158 : vector<8x80xf32>
    %cst_49 = arith.constant 5.000000e-01 : f32
    %160 = vector.broadcast %cst_49 : f32 to vector<8x80xf32>
    %161 = arith.mulf %160, %159 : vector<8x80xf32>
    %162 = math.tanh %161 : vector<8x80xf32>
    %cst_50 = arith.constant 1.000000e+00 : f32
    %163 = vector.broadcast %cst_50 : f32 to vector<8x80xf32>
    %164 = arith.addf %162, %163 : vector<8x80xf32>
    %cst_51 = arith.constant 5.000000e-01 : f32
    %165 = vector.broadcast %cst_51 : f32 to vector<8x80xf32>
    %166 = arith.mulf %165, %164 : vector<8x80xf32>
    %167 = arith.mulf %147, %166 : vector<8x80xf32>
    %cst_52 = arith.constant dense<0.000000e+00> : vector<8x80xf32>
    %168 = tpu.matmul %4, %167, %cst_52 {dimension_numbers = #tpu.dot_dimension_numbers<[1], [0], [0], [1], [0, 0, 1, 1], [], []>} : vector<8x8xf32>, vector<8x80xf32>, vector<8x80xf32> -> vector<8x80xf32>
    %169 = arith.addf %12, %168 : vector<8x80xf32>
    %170 = math.tanh %169 : vector<8x80xf32>
    %171 = arith.subf %170, %147 : vector<8x80xf32>
    %172 = arith.mulf %157, %171 : vector<8x80xf32>
    %173 = arith.addf %147, %172 : vector<8x80xf32>
    %c2 = arith.constant 2 : index
    %c0_53 = arith.constant 0 : index
    %c0_54 = arith.constant 0 : index
    %174 = vector.load %arg3[%c2, %c0_53, %c0_54] : memref<4x1x80xf32, #tpu.memory_space<vmem>>, vector<1x1x80xf32>
    %175 = vector.shape_cast %174 : vector<1x1x80xf32> to vector<1x80xf32>
    %176 = vector.extract_strided_slice %173 {offsets = [0, 0], sizes = [8, 79], strides = [1, 1]} : vector<8x80xf32> to vector<8x79xf32>
    %177 = tpu.concatenate %14, %176 in 1 : vector<8x1xf32>, vector<8x79xf32> -> vector<8x80xf32>
    %178 = vector.broadcast %175 : vector<1x80xf32> to vector<8x80xf32>
    %179 = arith.mulf %177, %178 : vector<8x80xf32>
    %cst_55 = arith.constant dense<0.000000e+00> : vector<8xf32>
    %180 = vector.multi_reduction <add>, %179, %cst_55 [1] : vector<8x80xf32> to vector<8xf32>
    %181 = vector.shape_cast %180 : vector<8xf32> to vector<8x1xf32>
    %cst_56 = arith.constant 0.0357142873 : f32
    %182 = vector.broadcast %cst_56 : f32 to vector<8x1xf32>
    %183 = arith.mulf %181, %182 : vector<8x1xf32>
    %184 = vector.broadcast %183 : vector<8x1xf32> to vector<8x80xf32>
    %185 = arith.subf %179, %184 : vector<8x80xf32>
    %186 = vector.broadcast %175 : vector<1x80xf32> to vector<8x80xf32>
    %187 = arith.mulf %185, %186 : vector<8x80xf32>
    %188 = arith.mulf %187, %187 : vector<8x80xf32>
    %cst_57 = arith.constant dense<0.000000e+00> : vector<8xf32>
    %189 = vector.multi_reduction <add>, %188, %cst_57 [1] : vector<8x80xf32> to vector<8xf32>
    %190 = vector.shape_cast %189 : vector<8xf32> to vector<8x1xf32>
    %cst_58 = arith.constant 0.0357142873 : f32
    %191 = vector.broadcast %cst_58 : f32 to vector<8x1xf32>
    %192 = arith.mulf %190, %191 : vector<8x1xf32>
    %cst_59 = arith.constant 9.99999974E-6 : f32
    %193 = vector.broadcast %cst_59 : f32 to vector<8x1xf32>
    %194 = arith.addf %192, %193 : vector<8x1xf32>
    %195 = math.rsqrt %194 : vector<8x1xf32>
    %c1_60 = arith.constant 1 : index
    %c0_61 = arith.constant 0 : index
    %c0_62 = arith.constant 0 : index
    %196 = vector.load %arg10[%c1_60, %c0_61, %c0_62] : memref<3x8x1xf32, #tpu.memory_space<vmem>>, vector<1x8x1xf32>
    %197 = vector.shape_cast %196 : vector<1x8x1xf32> to vector<8x1xf32>
    %198 = arith.mulf %195, %197 : vector<8x1xf32>
    %199 = vector.broadcast %198 : vector<8x1xf32> to vector<8x80xf32>
    %200 = arith.mulf %187, %199 : vector<8x80xf32>
    %c1_63 = arith.constant 1 : index
    %c0_64 = arith.constant 0 : index
    %c0_65 = arith.constant 0 : index
    %201 = vector.load %arg11[%c1_63, %c0_64, %c0_65] : memref<3x8x1xf32, #tpu.memory_space<vmem>>, vector<1x8x1xf32>
    %202 = vector.shape_cast %201 : vector<1x8x1xf32> to vector<8x1xf32>
    %203 = vector.broadcast %202 : vector<8x1xf32> to vector<8x80xf32>
    %204 = arith.addf %200, %203 : vector<8x80xf32>
    %205 = vector.broadcast %175 : vector<1x80xf32> to vector<8x80xf32>
    %206 = arith.mulf %204, %205 : vector<8x80xf32>
    %207 = tpu.concatenate %13, %206, %13 in 1 : vector<8x12xf32>, vector<8x80xf32>, vector<8x12xf32> -> vector<8x104xf32>
    %208 = vector.extract_strided_slice %207 {offsets = [0, 0], sizes = [8, 80], strides = [1, 1]} : vector<8x104xf32> to vector<8x80xf32>
    %209 = vector.extract_strided_slice %207 {offsets = [0, 1], sizes = [8, 80], strides = [1, 1]} : vector<8x104xf32> to vector<8x80xf32>
    %210 = vector.extract_strided_slice %207 {offsets = [0, 2], sizes = [8, 80], strides = [1, 1]} : vector<8x104xf32> to vector<8x80xf32>
    %211 = vector.extract_strided_slice %207 {offsets = [0, 3], sizes = [8, 80], strides = [1, 1]} : vector<8x104xf32> to vector<8x80xf32>
    %212 = vector.extract_strided_slice %207 {offsets = [0, 4], sizes = [8, 80], strides = [1, 1]} : vector<8x104xf32> to vector<8x80xf32>
    %213 = vector.extract_strided_slice %207 {offsets = [0, 5], sizes = [8, 80], strides = [1, 1]} : vector<8x104xf32> to vector<8x80xf32>
    %214 = vector.extract_strided_slice %207 {offsets = [0, 6], sizes = [8, 80], strides = [1, 1]} : vector<8x104xf32> to vector<8x80xf32>
    %215 = vector.extract_strided_slice %207 {offsets = [0, 7], sizes = [8, 80], strides = [1, 1]} : vector<8x104xf32> to vector<8x80xf32>
    %216 = vector.extract_strided_slice %207 {offsets = [0, 8], sizes = [8, 80], strides = [1, 1]} : vector<8x104xf32> to vector<8x80xf32>
    %217 = vector.extract_strided_slice %207 {offsets = [0, 9], sizes = [8, 80], strides = [1, 1]} : vector<8x104xf32> to vector<8x80xf32>
    %218 = vector.extract_strided_slice %207 {offsets = [0, 10], sizes = [8, 80], strides = [1, 1]} : vector<8x104xf32> to vector<8x80xf32>
    %219 = vector.extract_strided_slice %207 {offsets = [0, 11], sizes = [8, 80], strides = [1, 1]} : vector<8x104xf32> to vector<8x80xf32>
    %220 = vector.extract_strided_slice %207 {offsets = [0, 12], sizes = [8, 80], strides = [1, 1]} : vector<8x104xf32> to vector<8x80xf32>
    %221 = vector.extract_strided_slice %207 {offsets = [0, 13], sizes = [8, 80], strides = [1, 1]} : vector<8x104xf32> to vector<8x80xf32>
    %222 = vector.extract_strided_slice %207 {offsets = [0, 14], sizes = [8, 80], strides = [1, 1]} : vector<8x104xf32> to vector<8x80xf32>
    %223 = vector.extract_strided_slice %207 {offsets = [0, 15], sizes = [8, 80], strides = [1, 1]} : vector<8x104xf32> to vector<8x80xf32>
    %224 = vector.extract_strided_slice %207 {offsets = [0, 16], sizes = [8, 80], strides = [1, 1]} : vector<8x104xf32> to vector<8x80xf32>
    %225 = vector.extract_strided_slice %207 {offsets = [0, 17], sizes = [8, 80], strides = [1, 1]} : vector<8x104xf32> to vector<8x80xf32>
    %226 = vector.extract_strided_slice %207 {offsets = [0, 18], sizes = [8, 80], strides = [1, 1]} : vector<8x104xf32> to vector<8x80xf32>
    %227 = vector.extract_strided_slice %207 {offsets = [0, 19], sizes = [8, 80], strides = [1, 1]} : vector<8x104xf32> to vector<8x80xf32>
    %228 = vector.extract_strided_slice %207 {offsets = [0, 20], sizes = [8, 80], strides = [1, 1]} : vector<8x104xf32> to vector<8x80xf32>
    %229 = vector.extract_strided_slice %207 {offsets = [0, 21], sizes = [8, 80], strides = [1, 1]} : vector<8x104xf32> to vector<8x80xf32>
    %230 = vector.extract_strided_slice %207 {offsets = [0, 22], sizes = [8, 80], strides = [1, 1]} : vector<8x104xf32> to vector<8x80xf32>
    %231 = vector.extract_strided_slice %207 {offsets = [0, 23], sizes = [8, 80], strides = [1, 1]} : vector<8x104xf32> to vector<8x80xf32>
    %232 = vector.extract_strided_slice %207 {offsets = [0, 24], sizes = [8, 80], strides = [1, 1]} : vector<8x104xf32> to vector<8x80xf32>
    %233 = tpu.concatenate %208, %209, %210, %211, %212, %213, %214, %215, %216, %217, %218, %219, %220, %221, %222, %223 in 0 : vector<8x80xf32>, vector<8x80xf32>, vector<8x80xf32>, vector<8x80xf32>, vector<8x80xf32>, vector<8x80xf32>, vector<8x80xf32>, vector<8x80xf32>, vector<8x80xf32>, vector<8x80xf32>, vector<8x80xf32>, vector<8x80xf32>, vector<8x80xf32>, vector<8x80xf32>, vector<8x80xf32>, vector<8x80xf32> -> vector<128x80xf32>
    %234 = tpu.concatenate %224, %225, %226, %227, %228, %229, %230, %231, %232 in 0 : vector<8x80xf32>, vector<8x80xf32>, vector<8x80xf32>, vector<8x80xf32>, vector<8x80xf32>, vector<8x80xf32>, vector<8x80xf32>, vector<8x80xf32>, vector<8x80xf32> -> vector<72x80xf32>
    %235 = tpu.concatenate %233, %234 in 0 : vector<128x80xf32>, vector<72x80xf32> -> vector<200x80xf32>
    %cst_66 = arith.constant dense<0.000000e+00> : vector<8x80xf32>
    %236 = tpu.matmul %1, %235, %cst_66 {dimension_numbers = #tpu.dot_dimension_numbers<[1], [0], [0], [1], [0, 0, 1, 1], [], []>} : vector<8x200xf32>, vector<200x80xf32>, vector<8x80xf32> -> vector<8x80xf32>
    %237 = vector.broadcast %2 : vector<8x1xf32> to vector<8x80xf32>
    %238 = arith.addf %236, %237 : vector<8x80xf32>
    %cst_67 = arith.constant 0.000000e+00 : f32
    %239 = vector.broadcast %cst_67 : f32 to vector<8x80xf32>
    %240 = arith.maximumf %238, %239 : vector<8x80xf32>
    %cst_68 = arith.constant dense<0.000000e+00> : vector<16x80xf32>
    %241 = tpu.matmul %3, %240, %cst_68 {dimension_numbers = #tpu.dot_dimension_numbers<[1], [0], [0], [1], [0, 0, 1, 1], [], []>} : vector<16x8xf32>, vector<8x80xf32>, vector<16x80xf32> -> vector<16x80xf32>
    %242 = vector.extract_strided_slice %241 {offsets = [0, 0], sizes = [8, 80], strides = [1, 1]} : vector<16x80xf32> to vector<8x80xf32>
    %243 = arith.addf %10, %242 : vector<8x80xf32>
    %cst_69 = arith.constant 5.000000e-01 : f32
    %244 = vector.broadcast %cst_69 : f32 to vector<8x80xf32>
    %245 = arith.mulf %244, %243 : vector<8x80xf32>
    %246 = math.tanh %245 : vector<8x80xf32>
    %cst_70 = arith.constant 1.000000e+00 : f32
    %247 = vector.broadcast %cst_70 : f32 to vector<8x80xf32>
    %248 = arith.addf %246, %247 : vector<8x80xf32>
    %cst_71 = arith.constant 5.000000e-01 : f32
    %249 = vector.broadcast %cst_71 : f32 to vector<8x80xf32>
    %250 = arith.mulf %249, %248 : vector<8x80xf32>
    %251 = vector.extract_strided_slice %241 {offsets = [8, 0], sizes = [8, 80], strides = [1, 1]} : vector<16x80xf32> to vector<8x80xf32>
    %252 = arith.addf %11, %251 : vector<8x80xf32>
    %cst_72 = arith.constant 5.000000e-01 : f32
    %253 = vector.broadcast %cst_72 : f32 to vector<8x80xf32>
    %254 = arith.mulf %253, %252 : vector<8x80xf32>
    %255 = math.tanh %254 : vector<8x80xf32>
    %cst_73 = arith.constant 1.000000e+00 : f32
    %256 = vector.broadcast %cst_73 : f32 to vector<8x80xf32>
    %257 = arith.addf %255, %256 : vector<8x80xf32>
    %cst_74 = arith.constant 5.000000e-01 : f32
    %258 = vector.broadcast %cst_74 : f32 to vector<8x80xf32>
    %259 = arith.mulf %258, %257 : vector<8x80xf32>
    %260 = arith.mulf %240, %259 : vector<8x80xf32>
    %cst_75 = arith.constant dense<0.000000e+00> : vector<8x80xf32>
    %261 = tpu.matmul %4, %260, %cst_75 {dimension_numbers = #tpu.dot_dimension_numbers<[1], [0], [0], [1], [0, 0, 1, 1], [], []>} : vector<8x8xf32>, vector<8x80xf32>, vector<8x80xf32> -> vector<8x80xf32>
    %262 = arith.addf %12, %261 : vector<8x80xf32>
    %263 = math.tanh %262 : vector<8x80xf32>
    %264 = arith.subf %263, %240 : vector<8x80xf32>
    %265 = arith.mulf %250, %264 : vector<8x80xf32>
    %266 = arith.addf %240, %265 : vector<8x80xf32>
    %c3 = arith.constant 3 : index
    %c0_76 = arith.constant 0 : index
    %c0_77 = arith.constant 0 : index
    %267 = vector.load %arg3[%c3, %c0_76, %c0_77] : memref<4x1x80xf32, #tpu.memory_space<vmem>>, vector<1x1x80xf32>
    %268 = vector.shape_cast %267 : vector<1x1x80xf32> to vector<1x80xf32>
    %269 = vector.extract_strided_slice %266 {offsets = [0, 0], sizes = [8, 79], strides = [1, 1]} : vector<8x80xf32> to vector<8x79xf32>
    %270 = tpu.concatenate %14, %269 in 1 : vector<8x1xf32>, vector<8x79xf32> -> vector<8x80xf32>
    %271 = vector.broadcast %268 : vector<1x80xf32> to vector<8x80xf32>
    %272 = arith.mulf %270, %271 : vector<8x80xf32>
    %cst_78 = arith.constant dense<0.000000e+00> : vector<8xf32>
    %273 = vector.multi_reduction <add>, %272, %cst_78 [1] : vector<8x80xf32> to vector<8xf32>
    %274 = vector.shape_cast %273 : vector<8xf32> to vector<8x1xf32>
    %cst_79 = arith.constant 0.0384615399 : f32
    %275 = vector.broadcast %cst_79 : f32 to vector<8x1xf32>
    %276 = arith.mulf %274, %275 : vector<8x1xf32>
    %277 = vector.broadcast %276 : vector<8x1xf32> to vector<8x80xf32>
    %278 = arith.subf %272, %277 : vector<8x80xf32>
    %279 = vector.broadcast %268 : vector<1x80xf32> to vector<8x80xf32>
    %280 = arith.mulf %278, %279 : vector<8x80xf32>
    %281 = arith.mulf %280, %280 : vector<8x80xf32>
    %cst_80 = arith.constant dense<0.000000e+00> : vector<8xf32>
    %282 = vector.multi_reduction <add>, %281, %cst_80 [1] : vector<8x80xf32> to vector<8xf32>
    %283 = vector.shape_cast %282 : vector<8xf32> to vector<8x1xf32>
    %cst_81 = arith.constant 0.0384615399 : f32
    %284 = vector.broadcast %cst_81 : f32 to vector<8x1xf32>
    %285 = arith.mulf %283, %284 : vector<8x1xf32>
    %cst_82 = arith.constant 9.99999974E-6 : f32
    %286 = vector.broadcast %cst_82 : f32 to vector<8x1xf32>
    %287 = arith.addf %285, %286 : vector<8x1xf32>
    %288 = math.rsqrt %287 : vector<8x1xf32>
    %c2_83 = arith.constant 2 : index
    %c0_84 = arith.constant 0 : index
    %c0_85 = arith.constant 0 : index
    %289 = vector.load %arg10[%c2_83, %c0_84, %c0_85] : memref<3x8x1xf32, #tpu.memory_space<vmem>>, vector<1x8x1xf32>
    %290 = vector.shape_cast %289 : vector<1x8x1xf32> to vector<8x1xf32>
    %291 = arith.mulf %288, %290 : vector<8x1xf32>
    %292 = vector.broadcast %291 : vector<8x1xf32> to vector<8x80xf32>
    %293 = arith.mulf %280, %292 : vector<8x80xf32>
    %c2_86 = arith.constant 2 : index
    %c0_87 = arith.constant 0 : index
    %c0_88 = arith.constant 0 : index
    %294 = vector.load %arg11[%c2_86, %c0_87, %c0_88] : memref<3x8x1xf32, #tpu.memory_space<vmem>>, vector<1x8x1xf32>
    %295 = vector.shape_cast %294 : vector<1x8x1xf32> to vector<8x1xf32>
    %296 = vector.broadcast %295 : vector<8x1xf32> to vector<8x80xf32>
    %297 = arith.addf %293, %296 : vector<8x80xf32>
    %298 = vector.broadcast %268 : vector<1x80xf32> to vector<8x80xf32>
    %299 = arith.mulf %297, %298 : vector<8x80xf32>
    %c0_89 = arith.constant 0 : index
    %c0_90 = arith.constant 0 : index
    %300 = vector.load %arg12[%c0_89, %c0_90] : memref<8x80xf32, #tpu.memory_space<vmem>>, vector<8x80xf32>
    tpu.vector_store %arg12[%c0_89, %c0_90], %299 {strides = array<i32>} : memref<8x80xf32, #tpu.memory_space<vmem>>, vector<8x80xf32>,
    return
  }
  func.func @transform_0(%arg0: i32) -> (i32, i32) {
    %c0_i32 = arith.constant 0 : i32
    %c0_i32_0 = arith.constant 0 : i32
    %c0_i32_1 = arith.constant 0 : i32
    return %c0_i32, %c0_i32_0 : i32, i32
  }
  func.func @transform_1(%arg0: i32) -> (i32, i32) {
    %c0_i32 = arith.constant 0 : i32
    %c0_i32_0 = arith.constant 0 : i32
    %c0_i32_1 = arith.constant 0 : i32
    return %c0_i32, %c0_i32_0 : i32, i32
  }
  func.func @transform_2(%arg0: i32) -> (i32, i32, i32) {
    %c0_i32 = arith.constant 0 : i32
    %c0_i32_0 = arith.constant 0 : i32
    %c0_i32_1 = arith.constant 0 : i32
    %c0_i32_2 = arith.constant 0 : i32
    return %c0_i32, %c0_i32_0, %c0_i32_1 : i32, i32, i32
  }
  func.func @transform_3(%arg0: i32) -> (i32, i32) {
    %c0_i32 = arith.constant 0 : i32
    %c0_i32_0 = arith.constant 0 : i32
    %c0_i32_1 = arith.constant 0 : i32
    return %c0_i32, %c0_i32_0 : i32, i32
  }
  func.func @transform_4(%arg0: i32) -> (i32, i32) {
    %c0_i32 = arith.constant 0 : i32
    %c0_i32_0 = arith.constant 0 : i32
    %c0_i32_1 = arith.constant 0 : i32
    return %c0_i32, %c0_i32_0 : i32, i32
  }
  func.func @transform_5(%arg0: i32) -> (i32, i32) {
    %c0_i32 = arith.constant 0 : i32
    %c0_i32_0 = arith.constant 0 : i32
    %c0_i32_1 = arith.constant 0 : i32
    return %c0_i32, %c0_i32_0 : i32, i32
  }
  func.func @transform_6(%arg0: i32) -> (i32, i32) {
    %c0_i32 = arith.constant 0 : i32
    %c0_i32_0 = arith.constant 0 : i32
    %c0_i32_1 = arith.constant 0 : i32
    return %c0_i32, %c0_i32_0 : i32, i32
  }
  func.func @transform_7(%arg0: i32) -> (i32, i32) {
    %c0_i32 = arith.constant 0 : i32
    %c0_i32_0 = arith.constant 0 : i32
    %c0_i32_1 = arith.constant 0 : i32
    return %c0_i32, %c0_i32_0 : i32, i32
  }
  func.func @transform_8(%arg0: i32) -> (i32, i32) {
    %c0_i32 = arith.constant 0 : i32
    %c0_i32_0 = arith.constant 0 : i32
    %c0_i32_1 = arith.constant 0 : i32
    return %c0_i32, %c0_i32_0 : i32, i32
  }
  func.func @transform_9(%arg0: i32) -> (i32, i32, i32) {
    %c0_i32 = arith.constant 0 : i32
    %c0_i32_0 = arith.constant 0 : i32
    %c0_i32_1 = arith.constant 0 : i32
    %c0_i32_2 = arith.constant 0 : i32
    return %c0_i32, %c0_i32_0, %c0_i32_1 : i32, i32, i32
  }
  func.func @transform_10(%arg0: i32) -> (i32, i32, i32) {
    %c0_i32 = arith.constant 0 : i32
    %c0_i32_0 = arith.constant 0 : i32
    %c0_i32_1 = arith.constant 0 : i32
    %c0_i32_2 = arith.constant 0 : i32
    return %c0_i32, %c0_i32_0, %c0_i32_1 : i32, i32, i32
  }
  func.func @transform_11(%arg0: i32) -> (i32, i32) {
    %c0_i32 = arith.constant 0 : i32
    %c0_i32_0 = arith.constant 0 : i32
    %c0_i32_1 = arith.constant 0 : i32
    return %c0_i32, %c0_i32_0 : i32, i32
  }
}

</mosaic_0001>

<bundles_post_ra>
// kernel: tpu_custom_call.1
= control target key start
LH: loop header
LB: loop body
LE: loop exit
PB: predicated region body
PF: predicated region fallthrough
CT: control target
= control target key end

     0   :  { %s1987_s0 = inlined_call_operand.vmem [shape: f32[8,80], index: 0, kind: input, shape index: {}]   ;;  %s1988_s1 = inlined_call_operand.vmem [shape: f32[8,1], index: 1, kind: input, shape index: {}]   ;;  %s1989_s2 = inlined_call_operand.vmem [shape: f32[4,1,80], index: 2, kind: input, shape index: {}]   ;;  %s1990_s3 = inlined_call_operand.vmem [shape: f32[8,200], index: 3, kind: input, shape index: {}]   ;;  %s1991_s4 = inlined_call_operand.vmem [shape: f32[8,1], index: 4, kind: input, shape index: {}]   ;;  %s1992_s5 = inlined_call_operand.vmem [shape: f32[24,8], index: 5, kind: input, shape index: {}]   ;;  %s1993_s6 = inlined_call_operand.vmem [shape: f32[24,1], index: 6, kind: input, shape index: {}]   ;;  %s1994_s7 = inlined_call_operand.vmem [shape: f32[16,8], index: 7, kind: input, shape index: {}]   ;;  %s1995_s8 = inlined_call_operand.vmem [shape: f32[8,8], index: 8, kind: input, shape index: {}]   ;;  %s1996_s9 = inlined_call_operand.vmem [shape: f32[3,8,1], index: 9, kind: input, shape index: {}]   ;;  %s1997_s10 = inlined_call_operand.vmem [shape: f32[3,8,1], index: 10, kind: input, shape index: {}]   ;;  %s1998_s11 = inlined_call_operand.hbm [shape: f32[8,80], index: 11, kind: output, shape index: {}]  }
   0x1   :  { %v157_v0 = vld [vmem:[%s1988_s1] sm:$0xff] }
   0x2   :  { %16 = vsyncpa [#allocation3], 0  ;;  %v1608_v1 = vmov 0   ;;  %v1277_v2 = vld [vmem:[%s1989_s2] ss:$0 sm:$0xff]  ;;  %s1609_s21 = smov 12  }
   0x3   :  { %1498 = vset.pattern.permute.xlu0 %v1608_v1  ;;  %1519 = vset.pattern.permute.xlu1 %v1608_v1  ;;  %v39_v5 = vld [vmem:[%s1987_s0] sm:$0xff]  ;;  %vm67_vm0 = vcmask 64512   ;;  %v1610_v7 = vmov 0.0   ;;  %vm1611_vm1 = vmmov 0   ;;  %v1612_v8 = vmov 0.0|0.0   ;;  %s1613_s0 = smov 125  }
   0x4   :  { %161 = vperm.xlu0 %1498, %v157_v0   ;;  %v46_v6 = vld [vmem:[%s1992_s5] sm:$0xff]  ;;  %1322 = vmatprep.subr.mxu0 %v1610_v7  ;;  %vm175_vm2 = vcmask 97280   ;;  %vm177_vm3 = vcmask 752640   ;;  %s1614_s25 = smov 127   ;;  %s1615_s26 = smov 123   ;;  %vm1628_vm4 = vmmov 1  }
   0x5   :  { %1324 = vmatprep.mubr.msk.f32.mxu0 %vm1611_vm1, %v1610_v7  ;;  %1323 = vmatpush3.msra.mxu0 %v39_v5  ;;  %s1616_s27 = smov 126   ;;  %s1617_s28 = smov 121   ;;  %vm1730_vm5 = vmpackc.low %vm1628_vm4, %vm177_vm3  ;;  %v1743_v25 = vld [vmem:[%s1990_s3 + $0x8] sm:$0xff]  ;;  %vm257_vm6 = vcmask 588800   ;;  %v42_v32 = vld [vmem:[%s1991_s4] sm:$0xff]  ;;  %vm508_vm7 = vcmask 7168  }
   0x6   :  { %1325 = vmatmul.mubr.msk.f32.vlgmr.msra.gmra.mrb[0].mxu0 %vm67_vm0, %v46_v6  ;;  %1363 = vmatprep.subr.bf16.mxu1 %v1612_v8  ;;  %s1618_s29 = smov 124   ;;  %s1619_s30 = smov 119   ;;  %v49_v35 = vld [vmem:[%s1993_s6] sm:$0xff]  ;;  %v47_v39 = vld [vmem:[%s1992_s5 + $0x8] sm:$0xff]  ;;  %v48_v0 = vld [vmem:[%s1992_s5 + $0x10] sm:$0xff]  ;;  %vm517_vm8 = vcmask 654336  }
   0x7   :  { %1327 = vmatprep.mubr.msk.f32.mxu0 %vm1611_vm1, %v1610_v7  ;;  %s1620_s12 = smov 122   ;;  %s1621_s13 = smov 117   ;;  %1279 = vmatprep.mubr.msk.f32.mxu1 %vm257_vm6, %v1743_v25  ;;  %v1777_v62 = vld [vmem:[%s1990_s3] sm:$0xff] }
   0x8   :  { %s1622_s14 = smov 120   ;;  %s1623_s15 = smov 115   ;;  %v1790_v1 = vld [vmem:[%s1994_s7] sm:$0xff] }
   0x9   :  { %s1624_s16 = smov 118   ;;  %s2001_s17 = smov 113  }
   0xa   :  { %s1626_s18 = smov 116   ;;  %s1627_s19 = smov 114   ;;  %1328 = vmatmul.mubr.msk.f32.gmra.mrb[2].mxu0 %vm67_vm0, %v47_v39 }
   0xb   :  { %s1999_s20 = smov 112   ;;  %1330 = vmatprep.mubr.msk.f32.mxu0 %vm1611_vm1, %v1610_v7  ;;  %s2005_s22 = smov 113  }
   0xc   :  { %s2006_s5 = smov 112  }
   0xe   :  { %1331 = vmatmul.mubr.msk.f32.gmra.mrb[4].mxu0 %vm67_vm0, %v48_v0 }
   0xf   :  { %1335 = vmatprep.mubr.msk.f32.mxu0 %vm67_vm0, %v1790_v1 }
  0x83   :  { %v162_v3 = vpop.permute.xlu0 %161 }
  0x84   :  { %v170_v4 = vmul.f32 %v1277_v2, %v162_v3  ;;  %v50_v2 = vld [vmem:[%s1993_s6 + $0x8] sm:$0xff]  ;;  %v51_v3 = vld [vmem:[%s1993_s6 + $0x10] sm:$0xff] }
  0x86   :  { %172 = vrot.lane.b32.xlu0 %v170_v4, %s1609_s21 }
  0xd9   :  { %v1759_v38 = vpop.f32.mrb[0].mxu0 }
  0xda   :  { %v1326_v40 = vpop.f32.mrb[1].mxu0 }
  0xdd   :  { %v148_v4 = vpop.f32.mrb[2].mxu0 }
  0xde   :  { %v1329_v5 = vpop.f32.mrb[3].mxu0 }
  0xf8   :  { %v173_v9 = vpop.permute.xlu0 %172 }
  0xf9   :  { %v176_v10 = vsel %vm175_vm2, 0.0, %v173_v9 }
  0xfa   :  { %v178_v11 = vsel %vm177_vm3, %v176_v10, 0.0 }
  0xfb   :  { %186 = vrot.lane.b32.xlu0 %v178_v11, %s1613_s0  ;;  %180 = vrot.lane.b32.xlu1 %v178_v11, %s1614_s25 }
  0xff   :  { %192 = vrot.lane.b32.xlu0 %v178_v11, %s1615_s26  ;;  %183 = vrot.lane.b32.xlu1 %v178_v11, %s1616_s27 }
 0x103   :  { %198 = vrot.lane.b32.xlu0 %v178_v11, %s1617_s28  ;;  %189 = vrot.lane.b32.xlu1 %v178_v11, %s1618_s29 }
 0x107   :  { %204 = vrot.lane.b32.xlu0 %v178_v11, %s1619_s30  ;;  %195 = vrot.lane.b32.xlu1 %v178_v11, %s1620_s12 }
 0x10b   :  { %210 = vrot.lane.b32.xlu0 %v178_v11, %s1621_s13  ;;  %201 = vrot.lane.b32.xlu1 %v178_v11, %s1622_s14 }
 0x10f   :  { %216 = vrot.lane.b32.xlu0 %v178_v11, %s1623_s15  ;;  %207 = vrot.lane.b32.xlu1 %v178_v11, %s1624_s16 }
 0x113   :  { %222 = vrot.lane.b32.xlu0 %v178_v11, %s2001_s17  ;;  %213 = vrot.lane.b32.xlu1 %v178_v11, %s1626_s18 }
 0x117   :  { %219 = vrot.lane.b32.xlu1 %v178_v11, %s1627_s19 }
 0x16d   :  { %v187_v12 = vpop.permute.xlu0 %186  ;;  %v181_v13 = vpop.permute.xlu1 %180 }
 0x16e   :  { %v1364_v15 = vpack.c.bf16 %v181_v13, %v176_v10  ;;  %v1499_v16 = vpack.i.bf16 %v181_v13, %v178_v11  ;;  %v1806_v13 = vld [vmem:[%s1994_s7 + $0x8] sm:$0xff] }
 0x170   :  { %1366 = vmatpush1.bf16.msk.msra.mxu1 %vm1730_vm5, %v1364_v15  ;;  %1500 = vrot.lane.b32.xlu1 %v1499_v16, %s1999_s20  ;;  %v153_v15 = vpop.f32.mrb[4].mxu0 }
 0x171   :  { %v193_v17 = vpop.permute.xlu0 %192  ;;  %v184_v18 = vpop.permute.xlu1 %183  ;;  %1367 = vmatprep.subr.bf16.mxu1 %v1612_v8 }
 0x172   :  { %v1368_v19 = vpack.c.bf16 %v187_v12, %v184_v18  ;;  %v1504_v20 = vpack.i.bf16 %v187_v12, %v184_v18  ;;  %v1332_v16 = vpop.f32.mrb[5].mxu0 }
 0x174   :  { %1369 = vmatpush1.bf16.msra.mxu1 %v1368_v19  ;;  %1505 = vrot.lane.b32.xlu0 %v1504_v20, %s1999_s20 }
 0x175   :  { %v199_v21 = vpop.permute.xlu0 %198  ;;  %v190_v22 = vpop.permute.xlu1 %189  ;;  %1370 = vmatprep.subr.bf16.mxu1 %v1612_v8 }
 0x176   :  { %v1371_v23 = vpack.c.bf16 %v193_v17, %v190_v22  ;;  %v1509_v24 = vpack.i.bf16 %v193_v17, %v190_v22 }
 0x178   :  { %1372 = vmatpush1.bf16.msra.mxu1 %v1371_v23  ;;  %1510 = vrot.lane.b32.xlu1 %v1509_v24, %s1999_s20 }
 0x179   :  { %v205_v26 = vpop.permute.xlu0 %204  ;;  %v196_v27 = vpop.permute.xlu1 %195  ;;  %1373 = vmatprep.subr.bf16.mxu1 %v1612_v8 }
 0x17a   :  { %v1374_v28 = vpack.c.bf16 %v199_v21, %v196_v27  ;;  %v1514_v29 = vpack.i.bf16 %v199_v21, %v196_v27 }
 0x17c   :  { %1375 = vmatpush1.bf16.msra.mxu1 %v1374_v28  ;;  %1515 = vrot.lane.b32.xlu0 %v1514_v29, %s1999_s20  ;;  %v1819_v28 = vld [vmem:[%s1995_s8] sm:$0xff]  ;;  %s1630_s8 = smov 1  }
 0x17d   :  { %v211_v30 = vpop.permute.xlu0 %210  ;;  %v202_v31 = vpop.permute.xlu1 %201  ;;  %1376 = vmatprep.subr.bf16.mxu1 %v1612_v8 }
 0x17e   :  { %v1377_v33 = vpack.c.bf16 %v205_v26, %v202_v31  ;;  %241 = vrot.lane.b32.xlu1 %v202_v31, %s1999_s20 }
 0x180   :  { %1378 = vmatpush1.bf16.msra.mxu1 %v1377_v33  ;;  %254 = vperm.xlu0 %1498, %v42_v32  }
 0x181   :  { %v208_v34 = vpop.permute.xlu1 %207  ;;  %1379 = vmatprep.subr.bf16.mxu1 %v1612_v8  ;;  %v217_v37 = vpop.permute.xlu0 %216 }
 0x182   :  { %v1380_v36 = vpack.c.bf16 %v211_v30, %v208_v34  ;;  %59 = vperm.xlu1 %1519, %v50_v2  }
 0x184   :  { %1381 = vmatpush1.bf16.msra.mxu1 %v1380_v36  ;;  %54 = vperm.xlu0 %1498, %v49_v35  }
 0x185   :  { %v214_v41 = vpop.permute.xlu1 %213  ;;  %1382 = vmatprep.subr.bf16.mxu1 %v1612_v8  ;;  %v223_v43 = vpop.permute.xlu0 %222 }
 0x186   :  { %v1383_v42 = vpack.c.bf16 %v217_v37, %v214_v41  ;;  %64 = vperm.xlu1 %1519, %v51_v3  }
 0x188   :  { %1384 = vmatpush1.bf16.msra.mxu1 %v1383_v42 }
 0x189   :  { %v220_v44 = vpop.permute.xlu1 %219  ;;  %1385 = vmatprep.subr.bf16.mxu1 %v1612_v8 }
 0x18a   :  { %v1386_v45 = vpack.c.bf16 %v223_v43, %v220_v44  ;;  %v1284_v44 = vld [vmem:[%s1989_s2 + $0x1] ss:$0 sm:$0xff] }
 0x18c   :  { %1387 = vmatpush1.bf16.msra.mxu1 %v1386_v45 }
 0x18d   :  { %1388 = vmatprep.subr.bf16.mxu1 %v1612_v8 }
 0x1e2   :  { %v1501_v46 = vpop.permute.xlu1 %1500 }
 0x1e3   :  { %v1503_v47 = vunpack.i.h.bf16 %v1501_v46  ;;  %v1502_v48 = vunpack.i.l.bf16 %v1501_v46 }
 0x1e5   :  { %v1389_v49 = vpack.c.bf16 %v1503_v47, %v1502_v48 }
 0x1e6   :  { %v1506_v50 = vpop.permute.xlu0 %1505 }
 0x1e7   :  { %v1508_v51 = vunpack.i.h.bf16 %v1506_v50  ;;  %v1507_v52 = vunpack.i.l.bf16 %v1506_v50  ;;  %1390 = vmatpush1.bf16.msra.mxu1 %v1389_v49  ;;  %v539_v49 = vld [vmem:[%s1997_s10] sm:$0xff] }
 0x1e8   :  { %1391 = vmatprep.subr.bf16.mxu1 %v1612_v8 }
 0x1e9   :  { %v1392_v53 = vpack.c.bf16 %v1508_v51, %v1507_v52 }
 0x1ea   :  { %v1511_v54 = vpop.permute.xlu1 %1510 }
 0x1eb   :  { %v1513_v55 = vunpack.i.h.bf16 %v1511_v54  ;;  %v1512_v56 = vunpack.i.l.bf16 %v1511_v54  ;;  %1393 = vmatpush1.bf16.msra.mxu1 %v1392_v53 }
 0x1ec   :  { %1394 = vmatprep.subr.bf16.mxu1 %v1612_v8 }
 0x1ed   :  { %v1395_v57 = vpack.c.bf16 %v1513_v55, %v1512_v56 }
 0x1ee   :  { %v1516_v58 = vpop.permute.xlu0 %1515 }
 0x1ef   :  { %v1518_v59 = vunpack.i.h.bf16 %v1516_v58  ;;  %v1517_v60 = vunpack.i.l.bf16 %v1516_v58  ;;  %1396 = vmatpush1.bf16.msra.mxu1 %v1395_v57 }
 0x1f0   :  { %1397 = vmatprep.subr.bf16.mxu1 %v1612_v8  ;;  %v242_v63 = vpop.permute.xlu1 %241 }
 0x1f1   :  { %v1398_v61 = vpack.c.bf16 %v1518_v59, %v1517_v60  ;;  %v531_v59 = vld [vmem:[%s1996_s9] sm:$0xff] }
 0x1f3   :  { %1399 = vmatpush1.bf16.msra.mxu1 %v1398_v61 }
 0x1f4   :  { %309 = vmatprep.subr.mxu1 %v1610_v7 }
 0x1f7   :  { %310 = vmatpush1.msra.mxu1 %v242_v63 }
 0x1f8   :  { %326 = vmatmul.mubr.f32.vlgmr.msra.gmra.mrb[0].mxu1 %v1777_v62  ;;  %1437 = vmatprep.subr.bf16.mxu1 %v1612_v8 }
 0x1f9   :  { %1295 = vmatprep.mubr.msk.f32.mxu1 %vm257_vm6, %v1743_v25 }
 0x1ff   :  { %v1800_v6 = vpop.permute.xlu0 %254 }
 0x201   :  { %v60_v17 = vpop.permute.xlu1 %59 }
 0x202   :  { %v1813_v18 = vadd.f32 %v148_v4, %v60_v17 }
 0x203   :  { %v55_v29 = vpop.permute.xlu0 %54 }
 0x204   :  { %v1827_v30 = vadd.f32 %v1759_v38, %v55_v29 }
 0x205   :  { %v65_v33 = vpop.permute.xlu1 %64 }
 0x206   :  { %v1830_v34 = vadd.f32 %v153_v15, %v65_v33 }
 0x2cb   :  { %v327_v9 = vpop.f32.mrb[0].mxu1 }
 0x2cc   :  { %v328_v10 = vadd.f32 %v327_v9, %v1800_v6  ;;  %v329_v11 = vpop.f32.mrb[1].mxu1 }
 0x2ce   :  { %v331_v12 = vmax.f32 %v328_v10, 0.0 }
 0x2d0   :  { %1333 = vmatprep.subr.mxu0 %v331_v12 }
 0x2d1   :  { %1334 = vmatpush3.msra.mxu0 %v331_v12 }
 0x2d2   :  { %1336 = vmatmul.mubr.msk.f32.vlgmr.msra.gmra.mrb[6].mxu0 %vm67_vm0, %v1806_v13  ;;  %1338 = vmatprep.subr.mxu0 %v1610_v7 }
 0x2d3   :  { %1340 = vmatprep.mubr.msk.f32.mxu0 %vm1611_vm1, %v1610_v7 }
 0x3a5   :  { %v1337_v19 = vpop.f32.mrb[6].mxu0 }
 0x3a6   :  { %v418_v20 = vadd.f32 %v1337_v19, %v1813_v18  ;;  %v404_v21 = vpop.f32.mrb[7].mxu0 }
 0x3a7   :  { %v413_v31 = vadd.f32 %v404_v21, %v1827_v30 }
 0x3a8   :  { %v419_v22 = vmul.f32 0.5, %v418_v20 }
 0x3a9   :  { %v414_v32 = vmul.f32 0.5, %v413_v31 }
 0x3aa   :  { %1560 = vtanh.f32 %v419_v22 }
 0x3ab   :  { %1562 = vtanh.f32 %v414_v32 }
 0x3b4   :  { %v1561_v23 = vpop.eup %1560 }
 0x3b5   :  { %v421_v24 = vadd.f32 1.0, %v1561_v23  ;;  %v1563_v39 = vpop.eup %1562 }
 0x3b6   :  { %v416_v40 = vadd.f32 1.0, %v1563_v39 }
 0x3b7   :  { %v422_v26 = vmul.f32 0.5, %v421_v24 }
 0x3b9   :  { %v423_v27 = vmul.f32 %v422_v26, %v331_v12 }
 0x3bb   :  { %1339 = vmatpush3.msra.mxu0 %v423_v27 }
 0x3bc   :  { %1341 = vmatmul.mubr.msk.f32.vlgmr.msra.gmra.mrb[8].mxu0 %vm67_vm0, %v1819_v28  ;;  %1400 = vmatprep.subr.bf16.mxu0 %v1612_v8 }
 0x3bd   :  { %1286 = vmatprep.mubr.msk.f32.mxu0 %vm257_vm6, %v1743_v25  ;;  %v417_v25 = vmul.f32 0.5, %v416_v40 }
 0x48f   :  { %v493_v35 = vpop.f32.mrb[8].mxu0 }
 0x490   :  { %v497_v36 = vadd.f32 %v493_v35, %v1830_v34  ;;  %v1342_v37 = vpop.f32.mrb[9].mxu0 }
 0x492   :  { %1564 = vtanh.f32 %v497_v36 }
 0x49c   :  { %v1565_v41 = vpop.eup %1564 }
 0x49d   :  { %v499_v42 = vsub.f32 %v1565_v41, %v331_v12 }
 0x49f   :  { %v500_v43 = vmul.f32 %v499_v42, %v417_v25 }
 0x4a1   :  { %v501_v38 = vadd.f32 %v500_v43, %v331_v12 }
 0x4a3   :  { %505 = vrot.lane.b32.xlu0 %v501_v38, %s1630_s8 }
 0x515   :  { %v506_v45 = vpop.permute.xlu0 %505 }
 0x516   :  { %v509_v46 = vsel %vm508_vm7, 0.0, %v506_v45 }
 0x517   :  { %v516_v47 = vmul.f32 %v1284_v44, %v509_v46 }
 0x519   :  { %v518_v48 = vsel %vm517_vm8, %v516_v47, 0.0 }
 0x51a   :  { %519 = vadd.xlane.f32.xlu1 %v518_v48 }
 0x52b   :  { %542 = vperm.xlu1 %1519, %v539_v49  }
 0x5a7   :  { %v520_v50 = vpop.xlane.xlu1 %519 }
 0x5a8   :  { %v521_v51 = vmul.f32 0.033333335, %v520_v50 }
 0x5aa   :  { %v522_v52 = vsub.f32 %v516_v47, %v521_v51 }
 0x5ab   :  { %v543_v2 = vpop.permute.xlu1 %542 }
 0x5ac   :  { %v523_v53 = vmul.f32 %v1284_v44, %v522_v52 }
 0x5ae   :  { %v524_v54 = vmul.f32 %v523_v53, %v523_v53 }
 0x5b0   :  { %v525_v55 = vsel %vm517_vm8, %v524_v54, 0.0 }
 0x5b1   :  { %526 = vadd.xlane.f32.xlu0 %v525_v55 }
 0x63e   :  { %v527_v56 = vpop.xlane.xlu0 %526 }
 0x63f   :  { %v528_v57 = vmul.f32 0.033333335, %v527_v56 }
 0x641   :  { %v529_v58 = vadd.f32 1e-05, %v528_v57 }
 0x643   :  { %1566 = vrsqrt.f32 %v529_v58 }
 0x64d   :  { %v1567_v60 = vpop.eup %1566 }
 0x64e   :  { %v532_v61 = vmul.f32 %v1567_v60, %v531_v59 }
 0x650   :  { %535 = vperm.xlu0 %1498, %v532_v61  }
 0x6cf   :  { %v536_v63 = vpop.permute.xlu0 %535 }
 0x6d0   :  { %v538_v0 = vmul.f32 %v536_v63, %v523_v53 }
 0x6d2   :  { %v545_v3 = vadd.f32 %v543_v2, %v538_v0 }
 0x6d4   :  { %v546_v4 = vmul.f32 %v1284_v44, %v545_v3 }
 0x6d6   :  { %548 = vrot.lane.b32.xlu1 %v546_v4, %s1609_s21 }
 0x748   :  { %v549_v5 = vpop.permute.xlu1 %548 }
 0x749   :  { %v551_v9 = vsel %vm175_vm2, 0.0, %v549_v5 }
 0x74a   :  { %v552_v10 = vsel %vm177_vm3, %v551_v9, 0.0 }
 0x74b   :  { %557 = vrot.lane.b32.xlu1 %v552_v10, %s1616_s27  ;;  %554 = vrot.lane.b32.xlu0 %v552_v10, %s1614_s25 }
 0x74f   :  { %563 = vrot.lane.b32.xlu1 %v552_v10, %s1618_s29  ;;  %560 = vrot.lane.b32.xlu0 %v552_v10, %s1613_s0 }
 0x753   :  { %569 = vrot.lane.b32.xlu1 %v552_v10, %s1620_s12  ;;  %566 = vrot.lane.b32.xlu0 %v552_v10, %s1615_s26 }
 0x757   :  { %575 = vrot.lane.b32.xlu1 %v552_v10, %s1622_s14  ;;  %572 = vrot.lane.b32.xlu0 %v552_v10, %s1617_s28 }
 0x75b   :  { %581 = vrot.lane.b32.xlu1 %v552_v10, %s1624_s16  ;;  %578 = vrot.lane.b32.xlu0 %v552_v10, %s1619_s30 }
 0x75f   :  { %587 = vrot.lane.b32.xlu1 %v552_v10, %s1626_s18  ;;  %584 = vrot.lane.b32.xlu0 %v552_v10, %s1621_s13 }
 0x763   :  { %593 = vrot.lane.b32.xlu1 %v552_v10, %s1627_s19  ;;  %590 = vrot.lane.b32.xlu0 %v552_v10, %s1623_s15 }
 0x767   :  { %596 = vrot.lane.b32.xlu0 %v552_v10, %s2005_s22 }
 0x7bd   :  { %v558_v11 = vpop.permute.xlu1 %557  ;;  %v555_v12 = vpop.permute.xlu0 %554 }
 0x7be   :  { %v1401_v15 = vpack.c.bf16 %v555_v12, %v551_v9  ;;  %v1520_v16 = vpack.i.bf16 %v555_v12, %v552_v10 }
 0x7c0   :  { %1403 = vmatpush1.bf16.msk.msra.mxu0 %vm1730_vm5, %v1401_v15  ;;  %1521 = vrot.lane.b32.xlu1 %v1520_v16, %s2006_s5 }
 0x7c1   :  { %v564_v17 = vpop.permute.xlu1 %563  ;;  %v561_v19 = vpop.permute.xlu0 %560  ;;  %1404 = vmatprep.subr.bf16.mxu0 %v1612_v8 }
 0x7c2   :  { %v1405_v20 = vpack.c.bf16 %v561_v19, %v558_v11  ;;  %v1525_v21 = vpack.i.bf16 %v561_v19, %v558_v11 }
 0x7c4   :  { %1406 = vmatpush1.bf16.msra.mxu0 %v1405_v20  ;;  %1526 = vrot.lane.b32.xlu0 %v1525_v21, %s2006_s5 }
 0x7c5   :  { %v570_v22 = vpop.permute.xlu1 %569  ;;  %v567_v23 = vpop.permute.xlu0 %566  ;;  %1407 = vmatprep.subr.bf16.mxu0 %v1612_v8 }
 0x7c6   :  { %v1408_v24 = vpack.c.bf16 %v567_v23, %v564_v17  ;;  %v1530_v26 = vpack.i.bf16 %v567_v23, %v564_v17 }
 0x7c8   :  { %1409 = vmatpush1.bf16.msra.mxu0 %v1408_v24  ;;  %1531 = vrot.lane.b32.xlu1 %v1530_v26, %s2006_s5 }
 0x7c9   :  { %v576_v27 = vpop.permute.xlu1 %575  ;;  %v573_v29 = vpop.permute.xlu0 %572  ;;  %1410 = vmatprep.subr.bf16.mxu0 %v1612_v8 }
 0x7ca   :  { %v1411_v31 = vpack.c.bf16 %v573_v29, %v570_v22  ;;  %v1535_v32 = vpack.i.bf16 %v573_v29, %v570_v22 }
 0x7cc   :  { %615 = vrot.lane.b32.xlu1 %v576_v27, %s2006_s5  ;;  %1412 = vmatpush1.bf16.msra.mxu0 %v1411_v31 }
 0x7cd   :  { %1536 = vrot.lane.b32.xlu0 %v1535_v32, %s2006_s5  ;;  %v582_v33 = vpop.permute.xlu1 %581  ;;  %v579_v35 = vpop.permute.xlu0 %578  ;;  %1413 = vmatprep.subr.bf16.mxu0 %v1612_v8 }
 0x7ce   :  { %v1414_v36 = vpack.c.bf16 %v579_v35, %v576_v27 }
 0x7d0   :  { %1415 = vmatpush1.bf16.msra.mxu0 %v1414_v36 }
 0x7d1   :  { %v585_v37 = vpop.permute.xlu0 %584  ;;  %1416 = vmatprep.subr.bf16.mxu0 %v1612_v8  ;;  %v588_v40 = vpop.permute.xlu1 %587 }
 0x7d2   :  { %v1417_v39 = vpack.c.bf16 %v585_v37, %v582_v33  ;;  %v1293_v37 = vld [vmem:[%s1997_s10 + $0x8] sm:$0xff] }
 0x7d4   :  { %1418 = vmatpush1.bf16.msra.mxu0 %v1417_v39 }
 0x7d5   :  { %v591_v41 = vpop.permute.xlu0 %590  ;;  %1419 = vmatprep.subr.bf16.mxu0 %v1612_v8  ;;  %v594_v42 = vpop.permute.xlu1 %593 }
 0x7d6   :  { %v1420_v25 = vpack.c.bf16 %v591_v41, %v588_v40 }
 0x7d8   :  { %1421 = vmatpush1.bf16.msra.mxu0 %v1420_v25 }
 0x7d9   :  { %v597_v43 = vpop.permute.xlu0 %596  ;;  %1422 = vmatprep.subr.bf16.mxu0 %v1612_v8 }
 0x7da   :  { %v1423_v38 = vpack.c.bf16 %v597_v43, %v594_v42 }
 0x7dc   :  { %1424 = vmatpush1.bf16.msra.mxu0 %v1423_v38 }
 0x7dd   :  { %1425 = vmatprep.subr.bf16.mxu0 %v1612_v8 }
 0x832   :  { %v1522_v44 = vpop.permute.xlu1 %1521 }
 0x833   :  { %v1524_v45 = vunpack.i.h.bf16 %v1522_v44  ;;  %v1523_v46 = vunpack.i.l.bf16 %v1522_v44 }
 0x835   :  { %v1426_v47 = vpack.c.bf16 %v1524_v45, %v1523_v46  ;;  %v1292_v46 = vld [vmem:[%s1996_s9 + $0x8] sm:$0xff] }
 0x836   :  { %v1527_v48 = vpop.permute.xlu0 %1526 }
 0x837   :  { %v1529_v49 = vunpack.i.h.bf16 %v1527_v48  ;;  %v1528_v50 = vunpack.i.l.bf16 %v1527_v48  ;;  %1427 = vmatpush1.bf16.msra.mxu0 %v1426_v47 }
 0x838   :  { %1428 = vmatprep.subr.bf16.mxu0 %v1612_v8 }
 0x839   :  { %v1429_v51 = vpack.c.bf16 %v1529_v49, %v1528_v50 }
 0x83a   :  { %v1532_v52 = vpop.permute.xlu1 %1531 }
 0x83b   :  { %v1534_v53 = vunpack.i.h.bf16 %v1532_v52  ;;  %v1533_v54 = vunpack.i.l.bf16 %v1532_v52  ;;  %1430 = vmatpush1.bf16.msra.mxu0 %v1429_v51 }
 0x83c   :  { %1431 = vmatprep.subr.bf16.mxu0 %v1612_v8 }
 0x83d   :  { %v1432_v55 = vpack.c.bf16 %v1534_v53, %v1533_v54 }
 0x83e   :  { %v616_v60 = vpop.permute.xlu1 %615 }
 0x83f   :  { %v1537_v56 = vpop.permute.xlu0 %1536  ;;  %1433 = vmatpush1.bf16.msra.mxu0 %v1432_v55 }
 0x840   :  { %v1539_v57 = vunpack.i.h.bf16 %v1537_v56  ;;  %v1538_v58 = vunpack.i.l.bf16 %v1537_v56  ;;  %1434 = vmatprep.subr.bf16.mxu0 %v1612_v8 }
 0x842   :  { %v1435_v59 = vpack.c.bf16 %v1539_v57, %v1538_v58 }
 0x844   :  { %1436 = vmatpush1.bf16.msra.mxu0 %v1435_v59 }
 0x845   :  { %674 = vmatprep.subr.mxu0 %v1610_v7 }
 0x848   :  { %675 = vmatpush1.msra.mxu0 %v616_v60 }
 0x849   :  { %691 = vmatmul.mubr.f32.vlgmr.msra.gmra.mrb[10].mxu0 %v1777_v62 }
 0x84a   :  { %1345 = vmatprep.mubr.msk.f32.mxu0 %vm67_vm0, %v1790_v1 }
 0x91c   :  { %v692_v61 = vpop.f32.mrb[10].mxu0 }
 0x91d   :  { %v693_v63 = vadd.f32 %v692_v61, %v1800_v6  ;;  %v694_v0 = vpop.f32.mrb[11].mxu0 }
 0x91f   :  { %v696_v2 = vmax.f32 %v693_v63, 0.0 }
 0x921   :  { %1343 = vmatprep.subr.mxu0 %v696_v2 }
 0x922   :  { %1344 = vmatpush3.msra.mxu0 %v696_v2 }
 0x923   :  { %1346 = vmatmul.mubr.msk.f32.vlgmr.msra.gmra.mrb[12].mxu0 %vm67_vm0, %v1806_v13  ;;  %1348 = vmatprep.subr.mxu0 %v1610_v7 }
 0x924   :  { %1350 = vmatprep.mubr.msk.f32.mxu0 %vm1611_vm1, %v1610_v7 }
 0x9f6   :  { %v1347_v3 = vpop.f32.mrb[12].mxu0 }
 0x9f7   :  { %v777_v4 = vadd.f32 %v1347_v3, %v1813_v18  ;;  %v763_v5 = vpop.f32.mrb[13].mxu0 }
 0x9f8   :  { %v772_v16 = vadd.f32 %v763_v5, %v1827_v30 }
 0x9f9   :  { %v778_v9 = vmul.f32 0.5, %v777_v4 }
 0x9fa   :  { %v773_v17 = vmul.f32 0.5, %v772_v16 }
 0x9fb   :  { %1568 = vtanh.f32 %v778_v9 }
 0x9fc   :  { %1570 = vtanh.f32 %v773_v17 }
 0xa05   :  { %v1569_v10 = vpop.eup %1568 }
 0xa06   :  { %v780_v11 = vadd.f32 1.0, %v1569_v10  ;;  %v1571_v22 = vpop.eup %1570 }
 0xa07   :  { %v775_v23 = vadd.f32 1.0, %v1571_v22 }
 0xa08   :  { %v781_v12 = vmul.f32 0.5, %v780_v11 }
 0xa09   :  { %v776_v26 = vmul.f32 0.5, %v775_v23 }
 0xa0a   :  { %v782_v15 = vmul.f32 %v781_v12, %v696_v2 }
 0xa0c   :  { %1349 = vmatpush3.msra.mxu0 %v782_v15 }
 0xa0d   :  { %1351 = vmatmul.mubr.msk.f32.vlgmr.msra.gmra.mrb[14].mxu0 %vm67_vm0, %v1819_v28 }
 0xa0e   :  { %1355 = vmatprep.mubr.msk.f32.mxu0 %vm67_vm0, %v1790_v1  ;;  %v1291_v1 = vld [vmem:[%s1989_s2 + $0x2] ss:$0 sm:$0xff] }
 0xae0   :  { %v849_v19 = vpop.f32.mrb[14].mxu0 }
 0xae1   :  { %v853_v20 = vadd.f32 %v849_v19, %v1830_v34  ;;  %v1352_v21 = vpop.f32.mrb[15].mxu0 }
 0xae3   :  { %1572 = vtanh.f32 %v853_v20 }
 0xaed   :  { %v1573_v24 = vpop.eup %1572 }
 0xaee   :  { %v855_v27 = vsub.f32 %v1573_v24, %v696_v2 }
 0xaf0   :  { %v856_v29 = vmul.f32 %v855_v27, %v776_v26 }
 0xaf2   :  { %v857_v31 = vadd.f32 %v856_v29, %v696_v2 }
 0xaf4   :  { %861 = vrot.lane.b32.xlu0 %v857_v31, %s1630_s8 }
 0xb66   :  { %v862_v32 = vpop.permute.xlu0 %861 }
 0xb67   :  { %v864_v33 = vsel %vm508_vm7, 0.0, %v862_v32 }
 0xb68   :  { %v871_v35 = vmul.f32 %v1291_v1, %v864_v33 }
 0xb6a   :  { %v872_v36 = vsel %vm517_vm8, %v871_v35, 0.0 }
 0xb6b   :  { %873 = vadd.xlane.f32.xlu1 %v872_v36 }
 0xb7c   :  { %898 = vperm.xlu1 %1519, %v1293_v37  }
 0xbf8   :  { %v874_v39 = vpop.xlane.xlu1 %873 }
 0xbf9   :  { %v875_v40 = vmul.f32 0.035714287, %v874_v39 }
 0xbfb   :  { %v876_v41 = vsub.f32 %v871_v35, %v875_v40 }
 0xbfc   :  { %v899_v51 = vpop.permute.xlu1 %898 }
 0xbfd   :  { %v877_v25 = vmul.f32 %v1291_v1, %v876_v41 }
 0xbff   :  { %v878_v42 = vmul.f32 %v877_v25, %v877_v25 }
 0xc01   :  { %v879_v43 = vsel %vm517_vm8, %v878_v42, 0.0 }
 0xc02   :  { %880 = vadd.xlane.f32.xlu0 %v879_v43 }
 0xc8f   :  { %v881_v38 = vpop.xlane.xlu0 %880 }
 0xc90   :  { %v882_v44 = vmul.f32 0.035714287, %v881_v38 }
 0xc92   :  { %v883_v45 = vadd.f32 1e-05, %v882_v44 }
 0xc94   :  { %1574 = vrsqrt.f32 %v883_v45 }
 0xc9e   :  { %v1575_v47 = vpop.eup %1574 }
 0xc9f   :  { %v887_v48 = vmul.f32 %v1575_v47, %v1292_v46 }
 0xca1   :  { %890 = vperm.xlu0 %1498, %v887_v48  }
 0xd20   :  { %v891_v49 = vpop.permute.xlu0 %890 }
 0xd21   :  { %v893_v50 = vmul.f32 %v891_v49, %v877_v25 }
 0xd23   :  { %v901_v52 = vadd.f32 %v899_v51, %v893_v50 }
 0xd25   :  { %v902_v53 = vmul.f32 %v1291_v1, %v901_v52 }
 0xd27   :  { %904 = vrot.lane.b32.xlu1 %v902_v53, %s1609_s21 }
 0xd99   :  { %v905_v54 = vpop.permute.xlu1 %904 }
 0xd9a   :  { %v907_v55 = vsel %vm175_vm2, 0.0, %v905_v54 }
 0xd9b   :  { %v908_v56 = vsel %vm177_vm3, %v907_v55, 0.0 }
 0xd9c   :  { %913 = vrot.lane.b32.xlu1 %v908_v56, %s1616_s27  ;;  %910 = vrot.lane.b32.xlu0 %v908_v56, %s1614_s25 }
 0xda0   :  { %919 = vrot.lane.b32.xlu1 %v908_v56, %s1618_s29  ;;  %916 = vrot.lane.b32.xlu0 %v908_v56, %s1613_s0 }
 0xda4   :  { %925 = vrot.lane.b32.xlu1 %v908_v56, %s1620_s12  ;;  %922 = vrot.lane.b32.xlu0 %v908_v56, %s1615_s26 }
 0xda8   :  { %931 = vrot.lane.b32.xlu1 %v908_v56, %s1622_s14  ;;  %928 = vrot.lane.b32.xlu0 %v908_v56, %s1617_s28 }
 0xdac   :  { %937 = vrot.lane.b32.xlu1 %v908_v56, %s1624_s16  ;;  %934 = vrot.lane.b32.xlu0 %v908_v56, %s1619_s30 }
 0xdb0   :  { %943 = vrot.lane.b32.xlu1 %v908_v56, %s1626_s18  ;;  %940 = vrot.lane.b32.xlu0 %v908_v56, %s1621_s13 }
 0xdb4   :  { %949 = vrot.lane.b32.xlu1 %v908_v56, %s1627_s19  ;;  %946 = vrot.lane.b32.xlu0 %v908_v56, %s1623_s15 }
 0xdb8   :  { %952 = vrot.lane.b32.xlu0 %v908_v56, %s2005_s22 }
 0xe0e   :  { %v914_v57 = vpop.permute.xlu1 %913  ;;  %v911_v58 = vpop.permute.xlu0 %910 }
 0xe0f   :  { %v1438_v59 = vpack.c.bf16 %v911_v58, %v907_v55  ;;  %v1540_v60 = vpack.i.bf16 %v911_v58, %v908_v56 }
 0xe11   :  { %1440 = vmatpush1.bf16.msk.msra.mxu1 %vm1730_vm5, %v1438_v59  ;;  %1541 = vrot.lane.b32.xlu1 %v1540_v60, %s2006_s5 }
 0xe12   :  { %v920_v61 = vpop.permute.xlu1 %919  ;;  %v917_v63 = vpop.permute.xlu0 %916  ;;  %1441 = vmatprep.subr.bf16.mxu1 %v1612_v8 }
 0xe13   :  { %v1442_v0 = vpack.c.bf16 %v917_v63, %v914_v57  ;;  %v1545_v2 = vpack.i.bf16 %v917_v63, %v914_v57 }
 0xe15   :  { %1443 = vmatpush1.bf16.msra.mxu1 %v1442_v0  ;;  %1546 = vrot.lane.b32.xlu0 %v1545_v2, %s2006_s5 }
 0xe16   :  { %v926_v3 = vpop.permute.xlu1 %925  ;;  %v923_v4 = vpop.permute.xlu0 %922  ;;  %1444 = vmatprep.subr.bf16.mxu1 %v1612_v8 }
 0xe17   :  { %v1445_v5 = vpack.c.bf16 %v923_v4, %v920_v61  ;;  %v1550_v9 = vpack.i.bf16 %v923_v4, %v920_v61  ;;  %v1302_v4 = vld [vmem:[%s1997_s10 + $0x10] sm:$0xff]  ;;  %s1631_s10 = smov [#allocation2]  }
 0xe18   :  { %s1266_s28 = sshll.u32 %s1631_s10, 4  ;;  %s1267_s28 = int_to_ptr.vmem [resolvable:$true] %s1266_s28 }
 0xe19   :  { %1446 = vmatpush1.bf16.msra.mxu1 %v1445_v5  ;;  %1551 = vrot.lane.b32.xlu1 %v1550_v9, %s2006_s5  ;;  %s1584_s29 = scalar_lea.vmem %s1267_s28, 128  ;;  %p1589_p1 = scmp.lt.s32.totalorder %s1267_s28, %s1267_s28 }
 0xe1a   :  { %v932_v14 = vpop.permute.xlu1 %931  ;;  %v929_v10 = vpop.permute.xlu0 %928  ;;  %1447 = vmatprep.subr.bf16.mxu1 %v1612_v8  ;;  %p1585_p0 = scmp.ne.s32.totalorder %s1267_s28, %s1584_s29  ;;  %p1590_p2 = scmp.lt.s32.totalorder %s1584_s29, %s1584_s29 }
 0xe1b   :  { %v1448_v11 = vpack.c.bf16 %v929_v10, %v926_v3  ;;  %v1555_v12 = vpack.i.bf16 %v929_v10, %v926_v3 }
 0xe1c   :  { %p1591_p3 = por %p1590_p2, %p1589_p1 }
 0xe1d   :  { %971 = vrot.lane.b32.xlu1 %v932_v14, %s2006_s5  ;;  %1449 = vmatpush1.bf16.msra.mxu1 %v1448_v11 }
 0xe1e   :  { %1556 = vrot.lane.b32.xlu0 %v1555_v12, %s2006_s5  ;;  %v938_v15 = vpop.permute.xlu1 %937  ;;  %v935_v16 = vpop.permute.xlu0 %934  ;;  %1450 = vmatprep.subr.bf16.mxu1 %v1612_v8  ;;  %p1592_p4 = pnand %p1591_p3, %p1585_p0 }
 0xe1f   :  { %v1451_v17 = vpack.c.bf16 %v935_v16, %v932_v14 }
 0xe21   :  { %1452 = vmatpush1.bf16.msra.mxu1 %v1451_v17 }
 0xe22   :  { %v941_v19 = vpop.permute.xlu0 %940  ;;  %1453 = vmatprep.subr.bf16.mxu1 %v1612_v8  ;;  %v944_v21 = vpop.permute.xlu1 %943 }
 0xe23   :  { %v1454_v20 = vpack.c.bf16 %v941_v19, %v938_v15  ;;  %v1301_v19 = vld [vmem:[%s1996_s9 + $0x10] sm:$0xff] }
 0xe25   :  { %1455 = vmatpush1.bf16.msra.mxu1 %v1454_v20 }
 0xe26   :  { %v947_v22 = vpop.permute.xlu0 %946  ;;  %1456 = vmatprep.subr.bf16.mxu1 %v1612_v8  ;;  %v950_v24 = vpop.permute.xlu1 %949 }
 0xe27   :  { %v1457_v23 = vpack.c.bf16 %v947_v22, %v944_v21 }
 0xe29   :  { %1458 = vmatpush1.bf16.msra.mxu1 %v1457_v23 }
 0xe2a   :  { %v953_v26 = vpop.permute.xlu0 %952  ;;  %1459 = vmatprep.subr.bf16.mxu1 %v1612_v8 }
 0xe2b   :  { %v1460_v27 = vpack.c.bf16 %v953_v26, %v950_v24 }
 0xe2d   :  { %1461 = vmatpush1.bf16.msra.mxu1 %v1460_v27 }
 0xe2e   :  { %1462 = vmatprep.subr.bf16.mxu1 %v1612_v8 }
 0xe83   :  { %v1542_v29 = vpop.permute.xlu1 %1541 }
 0xe84   :  { %v1544_v31 = vunpack.i.h.bf16 %v1542_v29  ;;  %v1543_v1 = vunpack.i.l.bf16 %v1542_v29 }
 0xe86   :  { %v1463_v32 = vpack.c.bf16 %v1544_v31, %v1543_v1 }
 0xe87   :  { %v1547_v33 = vpop.permute.xlu0 %1546 }
 0xe88   :  { %v1549_v35 = vunpack.i.h.bf16 %v1547_v33  ;;  %v1548_v36 = vunpack.i.l.bf16 %v1547_v33  ;;  %1464 = vmatpush1.bf16.msra.mxu1 %v1463_v32 }
 0xe89   :  { %1465 = vmatprep.subr.bf16.mxu1 %v1612_v8 }
 0xe8a   :  { %v1466_v37 = vpack.c.bf16 %v1549_v35, %v1548_v36 }
 0xe8b   :  { %v1552_v39 = vpop.permute.xlu1 %1551 }
 0xe8c   :  { %v1554_v40 = vunpack.i.h.bf16 %v1552_v39  ;;  %v1553_v41 = vunpack.i.l.bf16 %v1552_v39  ;;  %1467 = vmatpush1.bf16.msra.mxu1 %v1466_v37 }
 0xe8d   :  { %1468 = vmatprep.subr.bf16.mxu1 %v1612_v8 }
 0xe8e   :  { %v1469_v25 = vpack.c.bf16 %v1554_v40, %v1553_v41 }
 0xe8f   :  { %v972_v45 = vpop.permute.xlu1 %971 }
 0xe90   :  { %v1557_v42 = vpop.permute.xlu0 %1556  ;;  %1470 = vmatpush1.bf16.msra.mxu1 %v1469_v25 }
 0xe91   :  { %v1559_v43 = vunpack.i.h.bf16 %v1557_v42  ;;  %v1558_v38 = vunpack.i.l.bf16 %v1557_v42  ;;  %1471 = vmatprep.subr.bf16.mxu1 %v1612_v8 }
 0xe93   :  { %v1472_v44 = vpack.c.bf16 %v1559_v43, %v1558_v38 }
 0xe95   :  { %1473 = vmatpush1.bf16.msra.mxu1 %v1472_v44 }
 0xe96   :  { %1030 = vmatprep.subr.mxu1 %v1610_v7 }
 0xe99   :  { %1031 = vmatpush1.msra.mxu1 %v972_v45 }
 0xe9a   :  { %1047 = vmatmul.mubr.f32.vlgmr.msra.gmra.mrb[2].mxu1 %v1777_v62 }
 0xf6d   :  { %v1048_v46 = vpop.f32.mrb[2].mxu1 }
 0xf6e   :  { %v1049_v47 = vadd.f32 %v1048_v46, %v1800_v6  ;;  %v1050_v48 = vpop.f32.mrb[3].mxu1 }
 0xf70   :  { %v1052_v49 = vmax.f32 %v1049_v47, 0.0 }
 0xf72   :  { %1353 = vmatprep.subr.mxu0 %v1052_v49 }
 0xf73   :  { %1354 = vmatpush3.msra.mxu0 %v1052_v49 }
 0xf74   :  { %1356 = vmatmul.mubr.msk.f32.vlgmr.msra.gmra.mrb[16].mxu0 %vm67_vm0, %v1806_v13  ;;  %1358 = vmatprep.subr.mxu0 %v1610_v7 }
 0xf75   :  { %1360 = vmatprep.mubr.msk.f32.mxu0 %vm1611_vm1, %v1610_v7 }
0x1047   :  { %v1357_v8 = vpop.f32.mrb[16].mxu0 }
0x1048   :  { %v1133_v50 = vadd.f32 %v1357_v8, %v1813_v18  ;;  %v1119_v51 = vpop.f32.mrb[17].mxu0 }
0x1049   :  { %v1128_v13 = vadd.f32 %v1119_v51, %v1827_v30 }
0x104a   :  { %v1134_v62 = vmul.f32 0.5, %v1133_v50 }
0x104b   :  { %v1129_v55 = vmul.f32 0.5, %v1128_v13 }
0x104c   :  { %1576 = vtanh.f32 %v1134_v62 }
0x104d   :  { %1578 = vtanh.f32 %v1129_v55 }
0x1056   :  { %v1577_v52 = vpop.eup %1576 }
0x1057   :  { %v1136_v6 = vadd.f32 1.0, %v1577_v52  ;;  %v1579_v18 = vpop.eup %1578 }
0x1058   :  { %v1131_v58 = vadd.f32 1.0, %v1579_v18 }
0x1059   :  { %v1137_v53 = vmul.f32 0.5, %v1136_v6 }
0x105a   :  { %v1132_v60 = vmul.f32 0.5, %v1131_v58 }
0x105b   :  { %v1138_v54 = vmul.f32 %v1137_v53, %v1052_v49 }
0x105d   :  { %1359 = vmatpush3.msra.mxu0 %v1138_v54 }
0x105e   :  { %1361 = vmatmul.mubr.msk.f32.vlgmr.msra.gmra.mrb[18].mxu0 %vm67_vm0, %v1819_v28  ;;  %v1300_v28 = vld [vmem:[%s1989_s2 + $0x3] ss:$0 sm:$0xff] }
0x1131   :  { %v1205_v56 = vpop.f32.mrb[18].mxu0 }
0x1132   :  { %v1209_v7 = vadd.f32 %v1205_v56, %v1830_v34  ;;  %v1362_v57 = vpop.f32.mrb[19].mxu0 }
0x1134   :  { %1580 = vtanh.f32 %v1209_v7 }
0x113e   :  { %v1581_v59 = vpop.eup %1580 }
0x113f   :  { %v1211_v61 = vsub.f32 %v1581_v59, %v1052_v49 }
0x1141   :  { %v1212_v63 = vmul.f32 %v1211_v61, %v1132_v60 }
0x1143   :  { %v1213_v0 = vadd.f32 %v1212_v63, %v1052_v49 }
0x1145   :  { %1217 = vrot.lane.b32.xlu0 %v1213_v0, %s1630_s8 }
0x11b7   :  { %v1218_v30 = vpop.permute.xlu0 %1217 }
0x11b8   :  { %v1220_v2 = vsel %vm508_vm7, 0.0, %v1218_v30 }
0x11b9   :  { %v1227_v3 = vmul.f32 %v1300_v28, %v1220_v2 }
0x11bb   :  { %v1228_v34 = vsel %vm517_vm8, %v1227_v3, 0.0 }
0x11bc   :  { %1229 = vadd.xlane.f32.xlu1 %v1228_v34 }
0x11cd   :  { %1254 = vperm.xlu1 %1519, %v1302_v4  }
0x1249   :  { %v1230_v5 = vpop.xlane.xlu1 %1229 }
0x124a   :  { %v1231_v9 = vmul.f32 0.03846154, %v1230_v5 }
0x124c   :  { %v1232_v14 = vsub.f32 %v1227_v3, %v1231_v9 }
0x124d   :  { %v1255_v24 = vpop.permute.xlu1 %1254 }
0x124e   :  { %v1233_v10 = vmul.f32 %v1300_v28, %v1232_v14 }
0x1250   :  { %v1234_v11 = vmul.f32 %v1233_v10, %v1233_v10 }
0x1252   :  { %v1235_v12 = vsel %vm517_vm8, %v1234_v11, 0.0 }
0x1253   :  { %1236 = vadd.xlane.f32.xlu0 %v1235_v12 }
0x12e0   :  { %v1237_v15 = vpop.xlane.xlu0 %1236 }
0x12e1   :  { %v1238_v16 = vmul.f32 0.03846154, %v1237_v15 }
0x12e3   :  { %v1239_v17 = vadd.f32 1e-05, %v1238_v16 }
0x12e5   :  { %1582 = vrsqrt.f32 %v1239_v17 }
0x12ef   :  { %v1583_v20 = vpop.eup %1582 }
0x12f0   :  { %v1243_v21 = vmul.f32 %v1583_v20, %v1301_v19 }
0x12f2   :  { %1246 = vperm.xlu0 %1498, %v1243_v21  }
0x1371   :  { %v1247_v22 = vpop.permute.xlu0 %1246 }
0x1372   :  { %v1249_v23 = vmul.f32 %v1247_v22, %v1233_v10 }
0x1374   :  { %v1257_v26 = vadd.f32 %v1255_v24, %v1249_v23 }
0x1376   :  { %v1258_v27 = vmul.f32 %v1300_v28, %v1257_v26 }
0x1378   :  { %1259 = vst.msk [vmem:[#allocation2] sm:$0xff] %vm517_vm8, %v1258_v27 }
0x1379   :  { %1595 = shalt.err (!%p1592_p4)
}
0x137a   :  { %s1596_s12 = scalar_lea.hbm %s1998_s11, 128 }
0x137b   :  { %p1597_p5 = scmp.ne.s32.totalorder %s1998_s11, %s1596_s12  ;;  %p1600_p6 = scmp.lt.u32.totalorder %s1596_s12, %s1998_s11 }
0x137d   :  { %p1602_p7 = pnand %p1600_p6, %p1597_p5 }
0x137f   :  { %1605 = shalt.err (!%p1602_p7)
}
0x1380   :  { %1269 = dma.vmem_to_hbm [thread:$0]  %s1267_s28, 128, %s1998_s11, [#allocation3]  }
0x1381   :  { %1606 = dma.done.wait [#allocation3], 128  }
0x1382   :  { %1607 = vsyncadd [#allocation3], 4294967168 }
0x1383   :  { %1273 = vsyncpa [#allocation3], 1 }

</bundles_post_ra>
